<compile_context>
chip_gen: v7x
topology: tpu7x:2x2x1
jax: 0.10.0
libtpu: 0.0.40
codegen_flags: <defaults>
</compile_context>

<pallas_src>
import jax
import jax.numpy as jnp
from jax import lax
from jax.experimental import pallas as pl
from jax.experimental.pallas import tpu as pltpu

HIDDEN_SIZE = 128
LETTER = [c for c in 'SE?abcdefghijklmnopqrstuvwxyz']
LETTER_SIZE = len(set(LETTER))  # 29


def _round_up(x, m):
    return (x + m - 1) // m * m


def _make_seq2seq_kernel(Te, Td, Bp):
    """Kernel specialized to static (Te, Td, B_pad) so both recurrences fully
    unroll with constant, 8-aligned sublane offsets and the hidden state lives
    in registers across steps."""

    def kernel(enc_in_ref, dec_in_ref, h0_ref,
               we_ih_ref, we_hh_ref, be_ref,
               wd_ih_ref, wd_hh_ref, bd_ref,
               wfc_ref, bfc_ref,
               out_ref, dec_h_scr):
        # enc_in_ref : (Te*Bp, Lp) bf16   dec_in_ref : (Td*Bp, Lp) bf16
        # h0_ref     : (Bp, H)    f32
        # we_ih/wd_ih: (Lp, H)    bf16    we_hh/wd_hh: (H, H) bf16
        # be/bd      : (1, H)     f32
        # wfc        : (H, Lp)    bf16    bfc        : (1, Lp) f32
        # out_ref    : (Td*Bp, Lp) f32    dec_h_scr  : VMEM (Td*Bp, H) bf16

        # ---- Hoisted input projections: one batched bf16 MXU matmul each,
        #      entirely off the serial recurrence path (f32 accumulate + bias).
        enc_proj = (jnp.dot(enc_in_ref[...], we_ih_ref[...],
                            preferred_element_type=jnp.float32)
                    + be_ref[...])                       # (Te*Bp, H) f32
        dec_proj = (jnp.dot(dec_in_ref[...], wd_ih_ref[...],
                            preferred_element_type=jnp.float32)
                    + bd_ref[...])                       # (Td*Bp, H) f32

        # ---- Recurrent weights loaded ONCE, resident across unrolled steps.
        we_hh = we_hh_ref[...]                           # (H, H) bf16
        wd_hh = wd_hh_ref[...]                           # (H, H) bf16

        # ---- Encoder recurrence: fully unrolled, h carried in registers (f32).
        h = h0_ref[...]                                  # (Bp, H) f32
        for t in range(Te):
            z = enc_proj[t * Bp:(t + 1) * Bp, :] + jnp.dot(
                h.astype(jnp.bfloat16), we_hh,
                preferred_element_type=jnp.float32)
            h = jnp.tanh(z)

        # ---- Decoder recurrence: stash bf16 hiddens, FC deferred out of loop.
        for t in range(Td):
            z = dec_proj[t * Bp:(t + 1) * Bp, :] + jnp.dot(
                h.astype(jnp.bfloat16), wd_hh,
                preferred_element_type=jnp.float32)
            h = jnp.tanh(z)
            dec_h_scr[pl.ds(t * Bp, Bp), :] = h.astype(jnp.bfloat16)

        # ---- One batched lane-dense FC matmul + one unmasked store.
        out_ref[...] = (jnp.dot(dec_h_scr[...], wfc_ref[...],
                                preferred_element_type=jnp.float32)
                        + bfc_ref[...]).astype(out_ref.dtype)

    return kernel


def seq2seq_forward(params, enc_input, enc_hidden, dec_input):
    """Mirrors Seq2Seq.forward.

    enc_input : (B, Te, L)   enc_hidden : (1, B, H)   dec_input : (B, Td, L)
    returns   : (Td, B, L)   (same as the PyTorch module)
    """
    enc_seq = jnp.transpose(enc_input, (1, 0, 2)).astype(jnp.float32)  # (Te,B,L)
    dec_seq = jnp.transpose(dec_input, (1, 0, 2)).astype(jnp.float32)  # (Td,B,L)
    h0 = enc_hidden[0].astype(jnp.float32)                             # (B,H)

    Te, B, L = enc_seq.shape
    Td = dec_seq.shape[0]
    H = h0.shape[-1]

    Bp = _round_up(B, 8)      # sublane-aligned batch
    Lp = _round_up(L, 128)    # lane-dense letter dim

    # --- Pad + flatten activations (bf16 MXU operands; one-hot exact in bf16).
    enc_p = jnp.pad(enc_seq, ((0, 0), (0, Bp - B), (0, Lp - L)))
    dec_p = jnp.pad(dec_seq, ((0, 0), (0, Bp - B), (0, Lp - L)))
    enc_flat = enc_p.reshape(Te * Bp, Lp).astype(jnp.bfloat16)
    dec_flat = dec_p.reshape(Td * Bp, Lp).astype(jnp.bfloat16)
    h0_p = jnp.pad(h0, ((0, Bp - B), (0, 0)))                          # (Bp,H) f32

    # --- Pad + cast weights (zero rows/cols so padding contributes nothing).
    we_ih = jnp.pad(params["we_ih"], ((0, Lp - L), (0, 0))).astype(jnp.bfloat16)
    wd_ih = jnp.pad(params["wd_ih"], ((0, Lp - L), (0, 0))).astype(jnp.bfloat16)
    we_hh = params["we_hh"].astype(jnp.bfloat16)
    wd_hh = params["wd_hh"].astype(jnp.bfloat16)
    wfc = jnp.pad(params["wfc"], ((0, 0), (0, Lp - L))).astype(jnp.bfloat16)
    bfc = jnp.pad(params["bfc"], ((0, 0), (0, Lp - L)))                # f32
    be, bd = params["be"], params["bd"]                                # f32

    kernel = _make_seq2seq_kernel(Te, Td, Bp)
    vmem_spec = pl.BlockSpec(memory_space=pltpu.MemorySpace.VMEM)
    out_flat = pl.pallas_call(
        kernel,
        out_shape=jax.ShapeDtypeStruct((Td * Bp, Lp), jnp.float32),
        in_specs=[vmem_spec] * 11,
        out_specs=vmem_spec,
        scratch_shapes=[pltpu.VMEM((Td * Bp, H), jnp.bfloat16)],
    )(enc_flat, dec_flat, h0_p,
      we_ih, we_hh, be,
      wd_ih, wd_hh, bd,
      wfc, bfc)

    # Drop padded batch rows and padded letter lanes.
    return out_flat.reshape(Td, Bp, Lp)[:, :B, :L]


def init_params(key, letter_size=LETTER_SIZE, hidden_size=HIDDEN_SIZE):
    """Deterministic init mimicking PyTorch's U(-1/sqrt(H), 1/sqrt(H))."""
    k = 1.0 / jnp.sqrt(hidden_size)
    keys = jax.random.split(key, 10)

    def u(kk, shape):
        return jax.random.uniform(kk, shape, jnp.float32, minval=-k, maxval=k)

    # Weights pre-transposed for row-major matmuls in the kernel.
    return {
        "we_ih": u(keys[0], (letter_size, hidden_size)),
        "we_hh": u(keys[1], (hidden_size, hidden_size)),
        # combined bias b_ih + b_hh, kept 2D for clean broadcasting on TPU
        "be":    u(keys[2], (1, hidden_size)) + u(keys[3], (1, hidden_size)),
        "wd_ih": u(keys[4], (letter_size, hidden_size)),
        "wd_hh": u(keys[5], (hidden_size, hidden_size)),
        "bd":    u(keys[6], (1, hidden_size)) + u(keys[7], (1, hidden_size)),
        "wfc":   u(keys[8], (hidden_size, letter_size)),
        "bfc":   u(keys[9], (1, letter_size)),
    }


def seq2seq_reference(params, enc_input, enc_hidden, dec_input):
    """Pure-JAX f32 reference (same math), for correctness checking."""
    enc_seq = jnp.transpose(enc_input, (1, 0, 2)).astype(jnp.float32)
    dec_seq = jnp.transpose(dec_input, (1, 0, 2)).astype(jnp.float32)
    h = enc_hidden[0].astype(jnp.float32)

    def enc_step(h, x):
        h = jnp.tanh(x @ params["we_ih"] + h @ params["we_hh"] + params["be"])
        return h, None

    h, _ = lax.scan(enc_step, h, enc_seq)

    def dec_step(h, x):
        h = jnp.tanh(x @ params["wd_ih"] + h @ params["wd_hh"] + params["bd"])
        o = h @ params["wfc"] + params["bfc"]
        return h, o

    _, out = lax.scan(dec_step, h, dec_seq)
    return out


if __name__ == "__main__":
    B, Te, Td = 2, 8, 8
    key = jax.random.PRNGKey(0)
    k_p, k_e, k_d = jax.random.split(key, 3)

    params = init_params(k_p)

    # One-hot inputs (as the original letter-embedding model would see).
    enc_ids = jax.random.randint(k_e, (B, Te), 0, LETTER_SIZE)
    dec_ids = jax.random.randint(k_d, (B, Td), 0, LETTER_SIZE)
    enc_input = jax.nn.one_hot(enc_ids, LETTER_SIZE, dtype=jnp.float32)  # (B,Te,L)
    dec_input = jax.nn.one_hot(dec_ids, LETTER_SIZE, dtype=jnp.float32)  # (B,Td,L)
    enc_hidden = jnp.zeros((1, B, HIDDEN_SIZE), jnp.float32)             # (1,B,H)

    out = seq2seq_forward(params, enc_input, enc_hidden, dec_input)
    out = jax.block_until_ready(out)

    ref = seq2seq_reference(params, enc_input, enc_hidden, dec_input)
    assert out.shape == (Td, B, LETTER_SIZE), out.shape
    # bf16 MXU operands through 16 recurrent steps vs. pure-f32 reference.
    assert jnp.allclose(out, ref, atol=2.5e-2, rtol=2.5e-2), (
        float(jnp.max(jnp.abs(out - ref))))

    print("KERNEL_OK")
</pallas_src>

<mosaic_0001>
module attributes {stable_mosaic.version = 11 : i64} {
  func.func @kernel(%arg0: memref<64x128xbf16, #tpu.memory_space<vmem>>, %arg1: memref<64x128xbf16, #tpu.memory_space<vmem>>, %arg2: memref<8x128xf32, #tpu.memory_space<vmem>>, %arg3: memref<128x128xbf16, #tpu.memory_space<vmem>>, %arg4: memref<128x128xbf16, #tpu.memory_space<vmem>>, %arg5: memref<1x128xf32, #tpu.memory_space<vmem>>, %arg6: memref<128x128xbf16, #tpu.memory_space<vmem>>, %arg7: memref<128x128xbf16, #tpu.memory_space<vmem>>, %arg8: memref<1x128xf32, #tpu.memory_space<vmem>>, %arg9: memref<128x128xbf16, #tpu.memory_space<vmem>>, %arg10: memref<1x128xf32, #tpu.memory_space<vmem>>, %arg11: memref<64x128xf32, #tpu.memory_space<vmem>>, %arg12: memref<64x128xbf16, #tpu.memory_space<vmem>>) attributes {dimension_semantics = [], scalar_prefetch = 0 : i64, scratch_operands = 1 : i64, tpu.core_type = #tpu.core_type<tc>} {
    %c0 = arith.constant 0 : index
    %c0_0 = arith.constant 0 : index
    %0 = vector.load %arg0[%c0, %c0_0] : memref<64x128xbf16, #tpu.memory_space<vmem>>, vector<64x128xbf16>
    %c0_1 = arith.constant 0 : index
    %c0_2 = arith.constant 0 : index
    %1 = vector.load %arg3[%c0_1, %c0_2] : memref<128x128xbf16, #tpu.memory_space<vmem>>, vector<128x128xbf16>
    %cst = arith.constant dense<0.000000e+00> : vector<64x128xf32>
    %2 = tpu.matmul %0, %1, %cst {dimension_numbers = #tpu.dot_dimension_numbers<[1], [0], [0], [1], [0, 0, 1, 1], [], []>} : vector<64x128xbf16>, vector<128x128xbf16>, vector<64x128xf32> -> vector<64x128xf32>
    %c0_3 = arith.constant 0 : index
    %c0_4 = arith.constant 0 : index
    %3 = vector.load %arg5[%c0_3, %c0_4] : memref<1x128xf32, #tpu.memory_space<vmem>>, vector<1x128xf32>
    %4 = vector.broadcast %3 : vector<1x128xf32> to vector<64x128xf32>
    %5 = arith.addf %2, %4 : vector<64x128xf32>
    %c0_5 = arith.constant 0 : index
    %c0_6 = arith.constant 0 : index
    %6 = vector.load %arg1[%c0_5, %c0_6] : memref<64x128xbf16, #tpu.memory_space<vmem>>, vector<64x128xbf16>
    %c0_7 = arith.constant 0 : index
    %c0_8 = arith.constant 0 : index
    %7 = vector.load %arg6[%c0_7, %c0_8] : memref<128x128xbf16, #tpu.memory_space<vmem>>, vector<128x128xbf16>
    %cst_9 = arith.constant dense<0.000000e+00> : vector<64x128xf32>
    %8 = tpu.matmul %6, %7, %cst_9 {dimension_numbers = #tpu.dot_dimension_numbers<[1], [0], [0], [1], [0, 0, 1, 1], [], []>} : vector<64x128xbf16>, vector<128x128xbf16>, vector<64x128xf32> -> vector<64x128xf32>
    %c0_10 = arith.constant 0 : index
    %c0_11 = arith.constant 0 : index
    %9 = vector.load %arg8[%c0_10, %c0_11] : memref<1x128xf32, #tpu.memory_space<vmem>>, vector<1x128xf32>
    %10 = vector.broadcast %9 : vector<1x128xf32> to vector<64x128xf32>
    %11 = arith.addf %8, %10 : vector<64x128xf32>
    %c0_12 = arith.constant 0 : index
    %c0_13 = arith.constant 0 : index
    %12 = vector.load %arg4[%c0_12, %c0_13] : memref<128x128xbf16, #tpu.memory_space<vmem>>, vector<128x128xbf16>
    %c0_14 = arith.constant 0 : index
    %c0_15 = arith.constant 0 : index
    %13 = vector.load %arg7[%c0_14, %c0_15] : memref<128x128xbf16, #tpu.memory_space<vmem>>, vector<128x128xbf16>
    %c0_16 = arith.constant 0 : index
    %c0_17 = arith.constant 0 : index
    %14 = vector.load %arg2[%c0_16, %c0_17] : memref<8x128xf32, #tpu.memory_space<vmem>>, vector<8x128xf32>
    %15 = vector.extract_strided_slice %5 {offsets = [0, 0], sizes = [8, 128], strides = [1, 1]} : vector<64x128xf32> to vector<8x128xf32>
    %16 = arith.truncf %14 : vector<8x128xf32> to vector<8x128xbf16>
    %cst_18 = arith.constant dense<0.000000e+00> : vector<8x128xf32>
    %17 = tpu.matmul %16, %12, %cst_18 {dimension_numbers = #tpu.dot_dimension_numbers<[1], [0], [0], [1], [0, 0, 1, 1], [], []>} : vector<8x128xbf16>, vector<128x128xbf16>, vector<8x128xf32> -> vector<8x128xf32>
    %18 = arith.addf %15, %17 : vector<8x128xf32>
    %19 = math.tanh %18 : vector<8x128xf32>
    %20 = vector.extract_strided_slice %5 {offsets = [8, 0], sizes = [8, 128], strides = [1, 1]} : vector<64x128xf32> to vector<8x128xf32>
    %21 = arith.truncf %19 : vector<8x128xf32> to vector<8x128xbf16>
    %cst_19 = arith.constant dense<0.000000e+00> : vector<8x128xf32>
    %22 = tpu.matmul %21, %12, %cst_19 {dimension_numbers = #tpu.dot_dimension_numbers<[1], [0], [0], [1], [0, 0, 1, 1], [], []>} : vector<8x128xbf16>, vector<128x128xbf16>, vector<8x128xf32> -> vector<8x128xf32>
    %23 = arith.addf %20, %22 : vector<8x128xf32>
    %24 = math.tanh %23 : vector<8x128xf32>
    %25 = vector.extract_strided_slice %5 {offsets = [16, 0], sizes = [8, 128], strides = [1, 1]} : vector<64x128xf32> to vector<8x128xf32>
    %26 = arith.truncf %24 : vector<8x128xf32> to vector<8x128xbf16>
    %cst_20 = arith.constant dense<0.000000e+00> : vector<8x128xf32>
    %27 = tpu.matmul %26, %12, %cst_20 {dimension_numbers = #tpu.dot_dimension_numbers<[1], [0], [0], [1], [0, 0, 1, 1], [], []>} : vector<8x128xbf16>, vector<128x128xbf16>, vector<8x128xf32> -> vector<8x128xf32>
    %28 = arith.addf %25, %27 : vector<8x128xf32>
    %29 = math.tanh %28 : vector<8x128xf32>
    %30 = vector.extract_strided_slice %5 {offsets = [24, 0], sizes = [8, 128], strides = [1, 1]} : vector<64x128xf32> to vector<8x128xf32>
    %31 = arith.truncf %29 : vector<8x128xf32> to vector<8x128xbf16>
    %cst_21 = arith.constant dense<0.000000e+00> : vector<8x128xf32>
    %32 = tpu.matmul %31, %12, %cst_21 {dimension_numbers = #tpu.dot_dimension_numbers<[1], [0], [0], [1], [0, 0, 1, 1], [], []>} : vector<8x128xbf16>, vector<128x128xbf16>, vector<8x128xf32> -> vector<8x128xf32>
    %33 = arith.addf %30, %32 : vector<8x128xf32>
    %34 = math.tanh %33 : vector<8x128xf32>
    %35 = vector.extract_strided_slice %5 {offsets = [32, 0], sizes = [8, 128], strides = [1, 1]} : vector<64x128xf32> to vector<8x128xf32>
    %36 = arith.truncf %34 : vector<8x128xf32> to vector<8x128xbf16>
    %cst_22 = arith.constant dense<0.000000e+00> : vector<8x128xf32>
    %37 = tpu.matmul %36, %12, %cst_22 {dimension_numbers = #tpu.dot_dimension_numbers<[1], [0], [0], [1], [0, 0, 1, 1], [], []>} : vector<8x128xbf16>, vector<128x128xbf16>, vector<8x128xf32> -> vector<8x128xf32>
    %38 = arith.addf %35, %37 : vector<8x128xf32>
    %39 = math.tanh %38 : vector<8x128xf32>
    %40 = vector.extract_strided_slice %5 {offsets = [40, 0], sizes = [8, 128], strides = [1, 1]} : vector<64x128xf32> to vector<8x128xf32>
    %41 = arith.truncf %39 : vector<8x128xf32> to vector<8x128xbf16>
    %cst_23 = arith.constant dense<0.000000e+00> : vector<8x128xf32>
    %42 = tpu.matmul %41, %12, %cst_23 {dimension_numbers = #tpu.dot_dimension_numbers<[1], [0], [0], [1], [0, 0, 1, 1], [], []>} : vector<8x128xbf16>, vector<128x128xbf16>, vector<8x128xf32> -> vector<8x128xf32>
    %43 = arith.addf %40, %42 : vector<8x128xf32>
    %44 = math.tanh %43 : vector<8x128xf32>
    %45 = vector.extract_strided_slice %5 {offsets = [48, 0], sizes = [8, 128], strides = [1, 1]} : vector<64x128xf32> to vector<8x128xf32>
    %46 = arith.truncf %44 : vector<8x128xf32> to vector<8x128xbf16>
    %cst_24 = arith.constant dense<0.000000e+00> : vector<8x128xf32>
    %47 = tpu.matmul %46, %12, %cst_24 {dimension_numbers = #tpu.dot_dimension_numbers<[1], [0], [0], [1], [0, 0, 1, 1], [], []>} : vector<8x128xbf16>, vector<128x128xbf16>, vector<8x128xf32> -> vector<8x128xf32>
    %48 = arith.addf %45, %47 : vector<8x128xf32>
    %49 = math.tanh %48 : vector<8x128xf32>
    %50 = vector.extract_strided_slice %5 {offsets = [56, 0], sizes = [8, 128], strides = [1, 1]} : vector<64x128xf32> to vector<8x128xf32>
    %51 = arith.truncf %49 : vector<8x128xf32> to vector<8x128xbf16>
    %cst_25 = arith.constant dense<0.000000e+00> : vector<8x128xf32>
    %52 = tpu.matmul %51, %12, %cst_25 {dimension_numbers = #tpu.dot_dimension_numbers<[1], [0], [0], [1], [0, 0, 1, 1], [], []>} : vector<8x128xbf16>, vector<128x128xbf16>, vector<8x128xf32> -> vector<8x128xf32>
    %53 = arith.addf %50, %52 : vector<8x128xf32>
    %54 = math.tanh %53 : vector<8x128xf32>
    %55 = vector.extract_strided_slice %11 {offsets = [0, 0], sizes = [8, 128], strides = [1, 1]} : vector<64x128xf32> to vector<8x128xf32>
    %56 = arith.truncf %54 : vector<8x128xf32> to vector<8x128xbf16>
    %cst_26 = arith.constant dense<0.000000e+00> : vector<8x128xf32>
    %57 = tpu.matmul %56, %13, %cst_26 {dimension_numbers = #tpu.dot_dimension_numbers<[1], [0], [0], [1], [0, 0, 1, 1], [], []>} : vector<8x128xbf16>, vector<128x128xbf16>, vector<8x128xf32> -> vector<8x128xf32>
    %58 = arith.addf %55, %57 : vector<8x128xf32>
    %59 = math.tanh %58 : vector<8x128xf32>
    %60 = arith.truncf %59 : vector<8x128xf32> to vector<8x128xbf16>
    %c0_27 = arith.constant 0 : index
    %c0_28 = arith.constant 0 : index
    %61 = vector.load %arg12[%c0_27, %c0_28] : memref<64x128xbf16, #tpu.memory_space<vmem>>, vector<8x128xbf16>
    tpu.vector_store %arg12[%c0_27, %c0_28], %60 {strides = array<i32>} : memref<64x128xbf16, #tpu.memory_space<vmem>>, vector<8x128xbf16>,
    %62 = vector.extract_strided_slice %11 {offsets = [8, 0], sizes = [8, 128], strides = [1, 1]} : vector<64x128xf32> to vector<8x128xf32>
    %63 = arith.truncf %59 : vector<8x128xf32> to vector<8x128xbf16>
    %cst_29 = arith.constant dense<0.000000e+00> : vector<8x128xf32>
    %64 = tpu.matmul %63, %13, %cst_29 {dimension_numbers = #tpu.dot_dimension_numbers<[1], [0], [0], [1], [0, 0, 1, 1], [], []>} : vector<8x128xbf16>, vector<128x128xbf16>, vector<8x128xf32> -> vector<8x128xf32>
    %65 = arith.addf %62, %64 : vector<8x128xf32>
    %66 = math.tanh %65 : vector<8x128xf32>
    %67 = arith.truncf %66 : vector<8x128xf32> to vector<8x128xbf16>
    %c8 = arith.constant 8 : index
    %c0_30 = arith.constant 0 : index
    %68 = vector.load %arg12[%c8, %c0_30] : memref<64x128xbf16, #tpu.memory_space<vmem>>, vector<8x128xbf16>
    tpu.vector_store %arg12[%c8, %c0_30], %67 {strides = array<i32>} : memref<64x128xbf16, #tpu.memory_space<vmem>>, vector<8x128xbf16>,
    %69 = vector.extract_strided_slice %11 {offsets = [16, 0], sizes = [8, 128], strides = [1, 1]} : vector<64x128xf32> to vector<8x128xf32>
    %70 = arith.truncf %66 : vector<8x128xf32> to vector<8x128xbf16>
    %cst_31 = arith.constant dense<0.000000e+00> : vector<8x128xf32>
    %71 = tpu.matmul %70, %13, %cst_31 {dimension_numbers = #tpu.dot_dimension_numbers<[1], [0], [0], [1], [0, 0, 1, 1], [], []>} : vector<8x128xbf16>, vector<128x128xbf16>, vector<8x128xf32> -> vector<8x128xf32>
    %72 = arith.addf %69, %71 : vector<8x128xf32>
    %73 = math.tanh %72 : vector<8x128xf32>
    %74 = arith.truncf %73 : vector<8x128xf32> to vector<8x128xbf16>
    %c16 = arith.constant 16 : index
    %c0_32 = arith.constant 0 : index
    %75 = vector.load %arg12[%c16, %c0_32] : memref<64x128xbf16, #tpu.memory_space<vmem>>, vector<8x128xbf16>
    tpu.vector_store %arg12[%c16, %c0_32], %74 {strides = array<i32>} : memref<64x128xbf16, #tpu.memory_space<vmem>>, vector<8x128xbf16>,
    %76 = vector.extract_strided_slice %11 {offsets = [24, 0], sizes = [8, 128], strides = [1, 1]} : vector<64x128xf32> to vector<8x128xf32>
    %77 = arith.truncf %73 : vector<8x128xf32> to vector<8x128xbf16>
    %cst_33 = arith.constant dense<0.000000e+00> : vector<8x128xf32>
    %78 = tpu.matmul %77, %13, %cst_33 {dimension_numbers = #tpu.dot_dimension_numbers<[1], [0], [0], [1], [0, 0, 1, 1], [], []>} : vector<8x128xbf16>, vector<128x128xbf16>, vector<8x128xf32> -> vector<8x128xf32>
    %79 = arith.addf %76, %78 : vector<8x128xf32>
    %80 = math.tanh %79 : vector<8x128xf32>
    %81 = arith.truncf %80 : vector<8x128xf32> to vector<8x128xbf16>
    %c24 = arith.constant 24 : index
    %c0_34 = arith.constant 0 : index
    %82 = vector.load %arg12[%c24, %c0_34] : memref<64x128xbf16, #tpu.memory_space<vmem>>, vector<8x128xbf16>
    tpu.vector_store %arg12[%c24, %c0_34], %81 {strides = array<i32>} : memref<64x128xbf16, #tpu.memory_space<vmem>>, vector<8x128xbf16>,
    %83 = vector.extract_strided_slice %11 {offsets = [32, 0], sizes = [8, 128], strides = [1, 1]} : vector<64x128xf32> to vector<8x128xf32>
    %84 = arith.truncf %80 : vector<8x128xf32> to vector<8x128xbf16>
    %cst_35 = arith.constant dense<0.000000e+00> : vector<8x128xf32>
    %85 = tpu.matmul %84, %13, %cst_35 {dimension_numbers = #tpu.dot_dimension_numbers<[1], [0], [0], [1], [0, 0, 1, 1], [], []>} : vector<8x128xbf16>, vector<128x128xbf16>, vector<8x128xf32> -> vector<8x128xf32>
    %86 = arith.addf %83, %85 : vector<8x128xf32>
    %87 = math.tanh %86 : vector<8x128xf32>
    %88 = arith.truncf %87 : vector<8x128xf32> to vector<8x128xbf16>
    %c32 = arith.constant 32 : index
    %c0_36 = arith.constant 0 : index
    %89 = vector.load %arg12[%c32, %c0_36] : memref<64x128xbf16, #tpu.memory_space<vmem>>, vector<8x128xbf16>
    tpu.vector_store %arg12[%c32, %c0_36], %88 {strides = array<i32>} : memref<64x128xbf16, #tpu.memory_space<vmem>>, vector<8x128xbf16>,
    %90 = vector.extract_strided_slice %11 {offsets = [40, 0], sizes = [8, 128], strides = [1, 1]} : vector<64x128xf32> to vector<8x128xf32>
    %91 = arith.truncf %87 : vector<8x128xf32> to vector<8x128xbf16>
    %cst_37 = arith.constant dense<0.000000e+00> : vector<8x128xf32>
    %92 = tpu.matmul %91, %13, %cst_37 {dimension_numbers = #tpu.dot_dimension_numbers<[1], [0], [0], [1], [0, 0, 1, 1], [], []>} : vector<8x128xbf16>, vector<128x128xbf16>, vector<8x128xf32> -> vector<8x128xf32>
    %93 = arith.addf %90, %92 : vector<8x128xf32>
    %94 = math.tanh %93 : vector<8x128xf32>
    %95 = arith.truncf %94 : vector<8x128xf32> to vector<8x128xbf16>
    %c40 = arith.constant 40 : index
    %c0_38 = arith.constant 0 : index
    %96 = vector.load %arg12[%c40, %c0_38] : memref<64x128xbf16, #tpu.memory_space<vmem>>, vector<8x128xbf16>
    tpu.vector_store %arg12[%c40, %c0_38], %95 {strides = array<i32>} : memref<64x128xbf16, #tpu.memory_space<vmem>>, vector<8x128xbf16>,
    %97 = vector.extract_strided_slice %11 {offsets = [48, 0], sizes = [8, 128], strides = [1, 1]} : vector<64x128xf32> to vector<8x128xf32>
    %98 = arith.truncf %94 : vector<8x128xf32> to vector<8x128xbf16>
    %cst_39 = arith.constant dense<0.000000e+00> : vector<8x128xf32>
    %99 = tpu.matmul %98, %13, %cst_39 {dimension_numbers = #tpu.dot_dimension_numbers<[1], [0], [0], [1], [0, 0, 1, 1], [], []>} : vector<8x128xbf16>, vector<128x128xbf16>, vector<8x128xf32> -> vector<8x128xf32>
    %100 = arith.addf %97, %99 : vector<8x128xf32>
    %101 = math.tanh %100 : vector<8x128xf32>
    %102 = arith.truncf %101 : vector<8x128xf32> to vector<8x128xbf16>
    %c48 = arith.constant 48 : index
    %c0_40 = arith.constant 0 : index
    %103 = vector.load %arg12[%c48, %c0_40] : memref<64x128xbf16, #tpu.memory_space<vmem>>, vector<8x128xbf16>
    tpu.vector_store %arg12[%c48, %c0_40], %102 {strides = array<i32>} : memref<64x128xbf16, #tpu.memory_space<vmem>>, vector<8x128xbf16>,
    %104 = vector.extract_strided_slice %11 {offsets = [56, 0], sizes = [8, 128], strides = [1, 1]} : vector<64x128xf32> to vector<8x128xf32>
    %105 = arith.truncf %101 : vector<8x128xf32> to vector<8x128xbf16>
    %cst_41 = arith.constant dense<0.000000e+00> : vector<8x128xf32>
    %106 = tpu.matmul %105, %13, %cst_41 {dimension_numbers = #tpu.dot_dimension_numbers<[1], [0], [0], [1], [0, 0, 1, 1], [], []>} : vector<8x128xbf16>, vector<128x128xbf16>, vector<8x128xf32> -> vector<8x128xf32>
    %107 = arith.addf %104, %106 : vector<8x128xf32>
    %108 = math.tanh %107 : vector<8x128xf32>
    %109 = arith.truncf %108 : vector<8x128xf32> to vector<8x128xbf16>
    %c56 = arith.constant 56 : index
    %c0_42 = arith.constant 0 : index
    %110 = vector.load %arg12[%c56, %c0_42] : memref<64x128xbf16, #tpu.memory_space<vmem>>, vector<8x128xbf16>
    tpu.vector_store %arg12[%c56, %c0_42], %109 {strides = array<i32>} : memref<64x128xbf16, #tpu.memory_space<vmem>>, vector<8x128xbf16>,
    %c0_43 = arith.constant 0 : index
    %c0_44 = arith.constant 0 : index
    %111 = vector.load %arg12[%c0_43, %c0_44] : memref<64x128xbf16, #tpu.memory_space<vmem>>, vector<64x128xbf16>
    %c0_45 = arith.constant 0 : index
    %c0_46 = arith.constant 0 : index
    %112 = vector.load %arg9[%c0_45, %c0_46] : memref<128x128xbf16, #tpu.memory_space<vmem>>, vector<128x128xbf16>
    %cst_47 = arith.constant dense<0.000000e+00> : vector<64x128xf32>
    %113 = tpu.matmul %111, %112, %cst_47 {dimension_numbers = #tpu.dot_dimension_numbers<[1], [0], [0], [1], [0, 0, 1, 1], [], []>} : vector<64x128xbf16>, vector<128x128xbf16>, vector<64x128xf32> -> vector<64x128xf32>
    %c0_48 = arith.constant 0 : index
    %c0_49 = arith.constant 0 : index
    %114 = vector.load %arg10[%c0_48, %c0_49] : memref<1x128xf32, #tpu.memory_space<vmem>>, vector<1x128xf32>
    %115 = vector.broadcast %114 : vector<1x128xf32> to vector<64x128xf32>
    %116 = arith.addf %113, %115 : vector<64x128xf32>
    %c0_50 = arith.constant 0 : index
    %c0_51 = arith.constant 0 : index
    %117 = vector.load %arg11[%c0_50, %c0_51] : memref<64x128xf32, #tpu.memory_space<vmem>>, vector<64x128xf32>
    tpu.vector_store %arg11[%c0_50, %c0_51], %116 {strides = array<i32>} : memref<64x128xf32, #tpu.memory_space<vmem>>, vector<64x128xf32>,
    return
  }
}

</mosaic_0001>

<bundles_post_ra>
// kernel: tpu_custom_call.1
= control target key start
LH: loop header
LB: loop body
LE: loop exit
PB: predicated region body
PF: predicated region fallthrough
CT: control target
= control target key end

     0   :  { %16 = vsyncpa [#allocation4], 0  ;;  %s3031_s0 = inlined_call_operand.hbm [shape: bf16[64,128], index: 0, kind: input, shape index: {}]   ;;  %s3032_s1 = inlined_call_operand.hbm [shape: bf16[64,128], index: 1, kind: input, shape index: {}]   ;;  %s3033_s2 = inlined_call_operand.hbm [shape: f32[8,128], index: 2, kind: input, shape index: {}]   ;;  %s3034_s3 = inlined_call_operand.hbm [shape: bf16[128,128], index: 3, kind: input, shape index: {}]   ;;  %s3035_s4 = inlined_call_operand.hbm [shape: bf16[128,128], index: 4, kind: input, shape index: {}]   ;;  %s3036_s5 = inlined_call_operand.vmem [shape: f32[1,128], index: 5, kind: input, shape index: {}]   ;;  %s3037_s6 = inlined_call_operand.hbm [shape: bf16[128,128], index: 6, kind: input, shape index: {}]   ;;  %s3038_s7 = inlined_call_operand.hbm [shape: bf16[128,128], index: 7, kind: input, shape index: {}]   ;;  %s3039_s8 = inlined_call_operand.vmem [shape: f32[1,128], index: 8, kind: input, shape index: {}]   ;;  %s3040_s9 = inlined_call_operand.hbm [shape: bf16[128,128], index: 9, kind: input, shape index: {}]   ;;  %s3041_s10 = inlined_call_operand.vmem [shape: f32[1,128], index: 10, kind: input, shape index: {}]   ;;  %s3042_s11 = inlined_call_operand.hbm [shape: f32[64,128], index: 11, kind: output, shape index: {}]  }
   0x1   :  { %17 = vsyncpa [#allocation7], 0 }
   0x2   :  { %18 = vsyncpa [#allocation10], 0 }
   0x3   :  { %19 = vsyncpa [#allocation13], 0 }
   0x4   :  { %20 = vsyncpa [#allocation16], 0 }
   0x5   :  { %21 = vsyncpa [#allocation5], 0  ;;  %s2418_s17 = smov [#allocation6]   ;;  %s2419_s19 = smov [#allocation9]  }
   0x6   :  { %s39_s18 = sshll.u32 %s2418_s17, 4  ;;  %s61_s20 = sshll.u32 %s2419_s19, 4  ;;  %s40_s18 = int_to_ptr.vmem [resolvable:$true] %s39_s18  ;;  %s2493_s20 = int_to_ptr.vmem [resolvable:$true] %s61_s20 }
   0x7   :  { %s2208_s23 = scalar_lea.hbm %s3032_s1, 512 }
   0x8   :  { %p2209_p0 = scmp.ne.s32.totalorder %s3032_s1, %s2208_s23  ;;  %p2212_p1 = scmp.lt.u32.totalorder %s2208_s23, %s3032_s1 }
   0xa   :  { %p2214_p2 = pnand %p2212_p1, %p2209_p0 }
   0xc   :  { %2217 = shalt.err (!%p2214_p2)
}
   0xd   :  { %s2218_s28 = scalar_lea.vmem %s40_s18, 512  ;;  %p2223_p4 = scmp.lt.s32.totalorder %s40_s18, %s40_s18 }
   0xe   :  { %p2219_p3 = scmp.ne.s32.totalorder %s40_s18, %s2218_s28  ;;  %p2224_p5 = scmp.lt.s32.totalorder %s2218_s28, %s2218_s28 }
  0x10   :  { %p2225_p6 = por %p2224_p5, %p2223_p4 }
  0x12   :  { %p2226_p7 = pnand %p2225_p6, %p2219_p3 }
  0x14   :  { %2229 = shalt.err (!%p2226_p7)
}
  0x15   :  { %s2420_s29 = smov 64   ;;  %s2421_s30 = smov 4  }
  0x16   :  { %45 = dma.hbm_to_vmem [thread:$0]  %s3032_s1, 512, %s40_s18, [#allocation7], %s2420_s29, %s2420_s29, %s2421_s30  }
  0x17   :  { %s2230_s16 = scalar_lea.hbm %s3034_s3, 1024 }
  0x18   :  { %p2231_p8 = scmp.ne.s32.totalorder %s3034_s3, %s2230_s16  ;;  %p2234_p9 = scmp.lt.u32.totalorder %s2230_s16, %s3034_s3 }
  0x1a   :  { %p2236_p10 = pnand %p2234_p9, %p2231_p8 }
  0x1c   :  { %2239 = shalt.err (!%p2236_p10)
}
  0x1d   :  { %s2240_s23 = scalar_lea.vmem %s2493_s20, 1024  ;;  %p2245_p12 = scmp.lt.s32.totalorder %s2493_s20, %s2493_s20 }
  0x1e   :  { %p2241_p11 = scmp.ne.s32.totalorder %s2493_s20, %s2240_s23  ;;  %p2246_p13 = scmp.lt.s32.totalorder %s2240_s23, %s2240_s23 }
  0x20   :  { %p2247_p0 = por %p2246_p13, %p2245_p12 }
  0x22   :  { %p2248_p1 = pnand %p2247_p0, %p2241_p11 }
  0x24   :  { %2251 = shalt.err (!%p2248_p1)
}
  0x25   :  { %67 = dma.hbm_to_vmem [thread:$0]  %s3034_s3, 1024, %s2493_s20, [#allocation10], %s2420_s29, %s2420_s29, %s2421_s30  }
  0x26   :  { %s2422_s24 = smov [#allocation12]   ;;  %s2423_s26 = smov [#allocation3]  }
  0x27   :  { %s87_s25 = sshll.u32 %s2422_s24, 4  ;;  %s27_s27 = sshll.u32 %s2423_s26, 4  ;;  %s88_s25 = int_to_ptr.vmem [resolvable:$true] %s87_s25  ;;  %s2530_s27 = int_to_ptr.vmem [resolvable:$true] %s27_s27 }
  0x28   :  { %s2252_s13 = scalar_lea.hbm %s3037_s6, 1024 }
  0x29   :  { %p2253_p2 = scmp.ne.s32.totalorder %s3037_s6, %s2252_s13  ;;  %p2256_p3 = scmp.lt.u32.totalorder %s2252_s13, %s3037_s6 }
  0x2b   :  { %p2258_p4 = pnand %p2256_p3, %p2253_p2 }
  0x2d   :  { %2261 = shalt.err (!%p2258_p4)
}
  0x2e   :  { %s2262_s3 = scalar_lea.vmem %s88_s25, 1024  ;;  %p2267_p6 = scmp.lt.s32.totalorder %s88_s25, %s88_s25 }
  0x2f   :  { %p2263_p5 = scmp.ne.s32.totalorder %s88_s25, %s2262_s3  ;;  %p2268_p7 = scmp.lt.s32.totalorder %s2262_s3, %s2262_s3 }
  0x31   :  { %p2269_p8 = por %p2268_p7, %p2267_p6 }
  0x33   :  { %p2270_p9 = pnand %p2269_p8, %p2263_p5 }
  0x35   :  { %2273 = shalt.err (!%p2270_p9)
}
  0x36   :  { %93 = dma.hbm_to_vmem [thread:$0]  %s3037_s6, 1024, %s88_s25, [#allocation13], %s2420_s29, %s2420_s29, %s2421_s30  }
  0x37   :  { %s2274_s23 = scalar_lea.hbm %s3031_s0, 512 }
  0x38   :  { %p2275_p10 = scmp.ne.s32.totalorder %s3031_s0, %s2274_s23  ;;  %p2278_p11 = scmp.lt.u32.totalorder %s2274_s23, %s3031_s0 }
  0x3a   :  { %p2280_p12 = pnand %p2278_p11, %p2275_p10 }
  0x3c   :  { %2283 = shalt.err (!%p2280_p12)
}
  0x3d   :  { %s2284_s28 = scalar_lea.vmem %s2530_s27, 512  ;;  %p2289_p0 = scmp.lt.s32.totalorder %s2530_s27, %s2530_s27 }
  0x3e   :  { %p2285_p13 = scmp.ne.s32.totalorder %s2530_s27, %s2284_s28  ;;  %p2290_p1 = scmp.lt.s32.totalorder %s2284_s28, %s2284_s28 }
  0x40   :  { %p2291_p2 = por %p2290_p1, %p2289_p0 }
  0x42   :  { %p2292_p3 = pnand %p2291_p2, %p2285_p13 }
  0x44   :  { %2295 = shalt.err (!%p2292_p3)
}
  0x45   :  { %33 = dma.hbm_to_vmem [thread:$0]  %s3031_s0, 512, %s2530_s27, [#allocation4], %s2420_s29, %s2420_s29, %s2421_s30  }
  0x46   :  { %s2424_s12 = smov [#allocation8]   ;;  %s2425_s14 = smov [#allocation11]  }
  0x47   :  { %s52_s13 = sshll.u32 %s2424_s12, 4  ;;  %s73_s15 = sshll.u32 %s2425_s14, 4  ;;  %s53_s13 = int_to_ptr.vmem [resolvable:$true] %s52_s13  ;;  %s2567_s15 = int_to_ptr.vmem [resolvable:$true] %s73_s15 }
  0x48   :  { %s2296_s3 = scalar_lea.hbm %s3033_s2, 128 }
  0x49   :  { %p2297_p4 = scmp.ne.s32.totalorder %s3033_s2, %s2296_s3  ;;  %p2300_p5 = scmp.lt.u32.totalorder %s2296_s3, %s3033_s2 }
  0x4b   :  { %p2302_p6 = pnand %p2300_p5, %p2297_p4 }
  0x4d   :  { %2305 = shalt.err (!%p2302_p6)
}
  0x4e   :  { %s2306_s0 = scalar_lea.vmem %s53_s13, 128  ;;  %p2311_p8 = scmp.lt.s32.totalorder %s53_s13, %s53_s13 }
  0x4f   :  { %p2307_p7 = scmp.ne.s32.totalorder %s53_s13, %s2306_s0  ;;  %p2312_p9 = scmp.lt.s32.totalorder %s2306_s0, %s2306_s0 }
  0x51   :  { %p2313_p10 = por %p2312_p9, %p2311_p8 }
  0x53   :  { %p2314_p11 = pnand %p2313_p10, %p2307_p7 }
  0x55   :  { %2317 = shalt.err (!%p2314_p11)
}
  0x56   :  { %55 = dma.hbm_to_vmem [thread:$0]  %s3033_s2, 128, %s53_s13, [#allocation7]  }
  0x57   :  { %s2318_s24 = scalar_lea.hbm %s3035_s4, 1024 }
  0x58   :  { %p2319_p12 = scmp.ne.s32.totalorder %s3035_s4, %s2318_s24  ;;  %p2322_p13 = scmp.lt.u32.totalorder %s2318_s24, %s3035_s4 }
  0x5a   :  { %p2324_p0 = pnand %p2322_p13, %p2319_p12 }
  0x5c   :  { %2327 = shalt.err (!%p2324_p0)
}
  0x5d   :  { %s2328_s12 = scalar_lea.vmem %s2567_s15, 1024  ;;  %p2333_p2 = scmp.lt.s32.totalorder %s2567_s15, %s2567_s15 }
  0x5e   :  { %p2329_p1 = scmp.ne.s32.totalorder %s2567_s15, %s2328_s12  ;;  %p2334_p3 = scmp.lt.s32.totalorder %s2328_s12, %s2328_s12 }
  0x60   :  { %p2335_p4 = por %p2334_p3, %p2333_p2 }
  0x62   :  { %p2336_p5 = pnand %p2335_p4, %p2329_p1 }
  0x64   :  { %2339 = shalt.err (!%p2336_p5)
}
  0x65   :  { %79 = dma.hbm_to_vmem [thread:$0]  %s3035_s4, 1024, %s2567_s15, [#allocation10], %s2420_s29, %s2420_s29, %s2421_s30  }
  0x66   :  { %s2426_s14 = smov [#allocation14]   ;;  %s2427_s17 = smov [#allocation15]  }
  0x67   :  { %s99_s16 = sshll.u32 %s2426_s14, 4  ;;  %s113_s3 = sshll.u32 %s2427_s17, 4  ;;  %s100_s16 = int_to_ptr.vmem [resolvable:$true] %s99_s16  ;;  %s2601_s3 = int_to_ptr.vmem [resolvable:$true] %s113_s3 }
  0x68   :  { %s2340_s21 = scalar_lea.hbm %s3038_s7, 1024 }
  0x69   :  { %p2341_p6 = scmp.ne.s32.totalorder %s3038_s7, %s2340_s21  ;;  %p2344_p7 = scmp.lt.u32.totalorder %s2340_s21, %s3038_s7 }
  0x6b   :  { %p2346_p8 = pnand %p2344_p7, %p2341_p6 }
  0x6d   :  { %2349 = shalt.err (!%p2346_p8)
}
  0x6e   :  { %s2350_s4 = scalar_lea.vmem %s100_s16, 1024  ;;  %p2355_p10 = scmp.lt.s32.totalorder %s100_s16, %s100_s16 }
  0x6f   :  { %p2351_p9 = scmp.ne.s32.totalorder %s100_s16, %s2350_s4  ;;  %p2356_p11 = scmp.lt.s32.totalorder %s2350_s4, %s2350_s4 }
  0x71   :  { %p2357_p12 = por %p2356_p11, %p2355_p10 }
  0x73   :  { %p2358_p13 = pnand %p2357_p12, %p2351_p9 }
  0x75   :  { %2361 = shalt.err (!%p2358_p13)
}
  0x76   :  { %105 = dma.hbm_to_vmem [thread:$0]  %s3038_s7, 1024, %s100_s16, [#allocation13], %s2420_s29, %s2420_s29, %s2421_s30  }
  0x77   :  { %s2362_s26 = scalar_lea.hbm %s3040_s9, 1024 }
  0x78   :  { %p2363_p0 = scmp.ne.s32.totalorder %s3040_s9, %s2362_s26  ;;  %p2366_p1 = scmp.lt.u32.totalorder %s2362_s26, %s3040_s9 }
  0x7a   :  { %p2368_p2 = pnand %p2366_p1, %p2363_p0 }
  0x7c   :  { %2371 = shalt.err (!%p2368_p2)
}
  0x7d   :  { %s2372_s2 = scalar_lea.vmem %s2601_s3, 1024  ;;  %p2377_p4 = scmp.lt.s32.totalorder %s2601_s3, %s2601_s3 }
  0x7e   :  { %p2373_p3 = scmp.ne.s32.totalorder %s2601_s3, %s2372_s2  ;;  %p2378_p5 = scmp.lt.s32.totalorder %s2372_s2, %s2372_s2 }
  0x80   :  { %p2379_p6 = por %p2378_p5, %p2377_p4 }
  0x82   :  { %p2380_p7 = pnand %p2379_p6, %p2373_p3 }
  0x84   :  { %2383 = shalt.err (!%p2380_p7)
}
  0x85   :  { %119 = dma.hbm_to_vmem [thread:$0]  %s3040_s9, 1024, %s2601_s3, [#allocation16], %s2420_s29, %s2420_s29, %s2421_s30  }
  0x86   :  { %2406 = dma.done.wait [#allocation4], 512  }
  0x87   :  { %2407 = vsyncadd [#allocation4], 4294966784 }
  0x88   :  { %2408 = dma.done.wait [#allocation7], 640  }
  0x89   :  { %2409 = vsyncadd [#allocation7], 4294966656 }
  0x8a   :  { %2410 = dma.done.wait [#allocation10], 2048  }
  0x8b   :  { %2411 = vsyncadd [#allocation10], 4294965248 }
  0x8c   :  { %2412 = dma.done.wait [#allocation13], 2048  }
  0x8d   :  { %2413 = vsyncadd [#allocation13], 4294965248 }
  0x8e   :  { %2414 = dma.done.wait [#allocation16], 1024  }
  0x8f   :  { %2415 = vsyncadd [#allocation16], 4294966272  ;;  %v2428_v0 = vmov 0.0   ;;  %vm2429_vm0 = vmmov 0   ;;  %v2128_v1 = vld [vmem:[#allocation9] sm:$0xff]   ;;  %v2130_v3 = vld [vmem:[#allocation9 + $0x8] sm:$0xff]  }
  0x90   :  { %1769 = vmatprep.subr.bf16.mxu0 %v2428_v0  ;;  %1785 = vmatprep.mubr.msk.bf16.mxu0 %vm2429_vm0, %v2428_v0  ;;  %v2641_v2 = vld [vmem:[#allocation11] sm:$0xff]   ;;  %v2644_v4 = vld [vmem:[#allocation11 + $0x8] sm:$0xff]   ;;  %v2132_v5 = vld [vmem:[#allocation9 + $0x10] sm:$0xff]  }
  0x91   :  { %1721 = vmatprep.subr.bf16.mxu1 %v2128_v1  ;;  %1770 = vmatpush3.bf16.msra.mxu0 %v2641_v2  ;;  %v2648_v6 = vld [vmem:[#allocation11 + $0x10] sm:$0xff]   ;;  %v2134_v7 = vld [vmem:[#allocation9 + $0x18] sm:$0xff]   ;;  %v2136_v9 = vld [vmem:[#allocation9 + $0x20] sm:$0xff]  }
  0x92   :  { %1722 = vmatpush3.bf16.msra.mxu1 %v2128_v1  ;;  %1771 = vmatprep.subr.bf16.mxu0 %v2428_v0  ;;  %v2652_v8 = vld [vmem:[#allocation11 + $0x18] sm:$0xff]   ;;  %v2655_v10 = vld [vmem:[#allocation11 + $0x20] sm:$0xff]   ;;  %v2138_v11 = vld [vmem:[#allocation9 + $0x28] sm:$0xff]  }
  0x93   :  { %1723 = vmatprep.subr.bf16.mxu1 %v2130_v3  ;;  %v2144_v12 = vld [vmem:[#allocation3] sm:$0xff]   ;;  %v2660_v13 = vld [vmem:[#allocation11 + $0x28] sm:$0xff]   ;;  %v2140_v14 = vld [vmem:[#allocation9 + $0x30] sm:$0xff]  }
  0x94   :  { %1737 = vmatprep.mubr.bf16.mxu1 %v2144_v12  ;;  %v2664_v15 = vld [vmem:[#allocation11 + $0x30] sm:$0xff]   ;;  %v2142_v16 = vld [vmem:[#allocation9 + $0x38] sm:$0xff]   ;;  %v2146_v19 = vld [vmem:[#allocation12] sm:$0xff]  }
  0x95   :  { %1772 = vmatpush3.bf16.msra.mxu0 %v2644_v4  ;;  %v2667_v17 = vld [vmem:[#allocation11 + $0x38] sm:$0xff]   ;;  %v2145_v20 = vld [vmem:[#allocation3 + $0x8] sm:$0xff]   ;;  %v2147_v22 = vld [vmem:[#allocation12 + $0x8] sm:$0xff]  }
  0x96   :  { %1724 = vmatpush3.bf16.msra.mxu1 %v2130_v3  ;;  %1773 = vmatprep.subr.bf16.mxu0 %v2428_v0  ;;  %v515_v18 = vld [vmem:[#allocation8] sm:$0xff]  ;;  %v2152_v23 = vld [vmem:[#allocation3 + $0x10] sm:$0xff]   ;;  %v2148_v24 = vld [vmem:[#allocation12 + $0x10] sm:$0xff]  }
  0x97   :  { %1725 = vmatprep.subr.bf16.mxu1 %v2132_v5  ;;  %v516_v21 = vpack.c.bf16 %v515_v18, %v515_v18  ;;  %v2153_v25 = vld [vmem:[#allocation3 + $0x18] sm:$0xff]   ;;  %v2156_v26 = vld [vmem:[#allocation6] sm:$0xff]   ;;  %v2150_v28 = vld [vmem:[#allocation12 + $0x20] sm:$0xff]  }
  0x98   :  { %v2149_v27 = vld [vmem:[#allocation12 + $0x18] sm:$0xff]   ;;  %v2151_v29 = vld [vmem:[#allocation12 + $0x28] sm:$0xff]   ;;  %v2154_v30 = vld [vmem:[#allocation12 + $0x30] sm:$0xff]  }
  0x99   :  { %1774 = vmatpush3.bf16.msra.mxu0 %v2648_v6  ;;  %v2155_v31 = vld [vmem:[#allocation12 + $0x38] sm:$0xff]   ;;  %v2157_v32 = vld [vmem:[#allocation6 + $0x8] sm:$0xff]   ;;  %v2158_v33 = vld [vmem:[#allocation6 + $0x10] sm:$0xff]  }
  0x9a   :  { %1726 = vmatpush3.bf16.msra.mxu1 %v2132_v5  ;;  %1775 = vmatprep.subr.bf16.mxu0 %v2428_v0  ;;  %v2159_v34 = vld [vmem:[#allocation6 + $0x18] sm:$0xff]   ;;  %v1490_v35 = vld [vmem:[%s3036_s5] ss:$0 sm:$0xff] }
  0x9b   :  { %1727 = vmatprep.subr.bf16.mxu1 %v2134_v7  ;;  %v2736_v59 = vld [vmem:[%s3039_s8] ss:$0 sm:$0xff] }
  0x9d   :  { %1776 = vmatpush3.bf16.msra.mxu0 %v2652_v8 }
  0x9e   :  { %1728 = vmatpush3.bf16.msra.mxu1 %v2134_v7  ;;  %1777 = vmatprep.subr.bf16.mxu0 %v2428_v0 }
  0x9f   :  { %1729 = vmatprep.subr.bf16.mxu1 %v2136_v9 }
  0xa1   :  { %1778 = vmatpush3.bf16.msra.mxu0 %v2655_v10 }
  0xa2   :  { %1730 = vmatpush3.bf16.msra.mxu1 %v2136_v9  ;;  %1779 = vmatprep.subr.bf16.mxu0 %v2428_v0 }
  0xa3   :  { %1731 = vmatprep.subr.bf16.mxu1 %v2138_v11 }
  0xa5   :  { %1780 = vmatpush3.bf16.msra.mxu0 %v2660_v13 }
  0xa6   :  { %1732 = vmatpush3.bf16.msra.mxu1 %v2138_v11  ;;  %1781 = vmatprep.subr.bf16.mxu0 %v2428_v0 }
  0xa7   :  { %1733 = vmatprep.subr.bf16.mxu1 %v2140_v14 }
  0xa9   :  { %1782 = vmatpush3.bf16.msra.mxu0 %v2664_v15 }
  0xaa   :  { %1734 = vmatpush3.bf16.msra.mxu1 %v2140_v14  ;;  %1783 = vmatprep.subr.bf16.mxu0 %v2428_v0 }
  0xab   :  { %1735 = vmatprep.subr.bf16.mxu1 %v2142_v16 }
  0xad   :  { %1784 = vmatpush3.bf16.msra.mxu0 %v2667_v17 }
  0xae   :  { %1736 = vmatpush3.bf16.msra.mxu1 %v2142_v16  ;;  %1809 = vmatprep.subr.bf16.mxu0 %v2428_v0 }
  0xaf   :  { %1745 = vmatprep.subr.bf16.mxu1 %v2146_v19 }
  0xb0   :  { %1786 = vmatmul.mubr.bf16.vlgmr.msra.gmra.mrb[0].mxu0 %v516_v21 }
  0xb1   :  { %1738 = vmatmul.mubr.bf16.vlgmr.msra.gmra.mrb[0].mxu1 %v2145_v20  ;;  %1810 = vmatpush3.bf16.msra.mxu0 %v2641_v2 }
  0xb2   :  { %1746 = vmatpush3.bf16.msra.mxu1 %v2146_v19  ;;  %1741 = vmatprep.mubr.bf16.mxu1 %v2152_v23 }
  0xb3   :  { %1747 = vmatprep.subr.bf16.mxu1 %v2147_v22  ;;  %1811 = vmatprep.subr.bf16.mxu0 %v2428_v0 }
  0xb4   :  { %1825 = vmatprep.mubr.msk.bf16.mxu0 %vm2429_vm0, %v2428_v0 }
  0xb5   :  { %1812 = vmatpush3.bf16.msra.mxu0 %v2644_v4 }
  0xb6   :  { %1748 = vmatpush3.bf16.msra.mxu1 %v2147_v22  ;;  %1813 = vmatprep.subr.bf16.mxu0 %v2428_v0 }
  0xb7   :  { %1749 = vmatprep.subr.bf16.mxu1 %v2148_v24 }
  0xb9   :  { %1742 = vmatmul.mubr.bf16.gmra.mrb[4].mxu1 %v2153_v25  ;;  %1814 = vmatpush3.bf16.msra.mxu0 %v2648_v6 }
  0xba   :  { %1750 = vmatpush3.bf16.msra.mxu1 %v2148_v24  ;;  %1761 = vmatprep.mubr.bf16.mxu1 %v2156_v26 }
  0xbb   :  { %1751 = vmatprep.subr.bf16.mxu1 %v2149_v27  ;;  %1815 = vmatprep.subr.bf16.mxu0 %v2428_v0 }
  0xbd   :  { %1816 = vmatpush3.bf16.msra.mxu0 %v2652_v8 }
  0xbe   :  { %1752 = vmatpush3.bf16.msra.mxu1 %v2149_v27  ;;  %1817 = vmatprep.subr.bf16.mxu0 %v2428_v0 }
  0xbf   :  { %1753 = vmatprep.subr.bf16.mxu1 %v2150_v28 }
  0xc1   :  { %1818 = vmatpush3.bf16.msra.mxu0 %v2655_v10 }
  0xc2   :  { %1754 = vmatpush3.bf16.msra.mxu1 %v2150_v28  ;;  %1819 = vmatprep.subr.bf16.mxu0 %v2428_v0 }
  0xc3   :  { %1755 = vmatprep.subr.bf16.mxu1 %v2151_v29 }
  0xc5   :  { %1820 = vmatpush3.bf16.msra.mxu0 %v2660_v13 }
  0xc6   :  { %1756 = vmatpush3.bf16.msra.mxu1 %v2151_v29  ;;  %1821 = vmatprep.subr.bf16.mxu0 %v2428_v0 }
  0xc7   :  { %1757 = vmatprep.subr.bf16.mxu1 %v2154_v30 }
  0xc9   :  { %1822 = vmatpush3.bf16.msra.mxu0 %v2664_v15 }
  0xca   :  { %1758 = vmatpush3.bf16.msra.mxu1 %v2154_v30  ;;  %1823 = vmatprep.subr.bf16.mxu0 %v2428_v0 }
  0xcb   :  { %1759 = vmatprep.subr.bf16.mxu1 %v2155_v31 }
  0xcd   :  { %1824 = vmatpush3.bf16.msra.mxu0 %v2667_v17 }
  0xce   :  { %1760 = vmatpush3.bf16.msra.mxu1 %v2155_v31  ;;  %1849 = vmatprep.subr.bf16.mxu0 %v2428_v0 }
  0xcf   :  { %1789 = vmatprep.subr.bf16.mxu1 %v2428_v0 }
  0xd1   :  { %1762 = vmatmul.mubr.bf16.vlgmr.msra.gmra.mrb[8].mxu1 %v2157_v32 }
  0xd2   :  { %1790 = vmatpush3.bf16.msra.mxu1 %v2641_v2  ;;  %1765 = vmatprep.mubr.bf16.mxu1 %v2158_v33 }
  0xd3   :  { %1791 = vmatprep.subr.bf16.mxu1 %v2428_v0 }
  0xd6   :  { %1792 = vmatpush3.bf16.msra.mxu1 %v2644_v4 }
  0xd7   :  { %1793 = vmatprep.subr.bf16.mxu1 %v2428_v0 }
  0xd9   :  { %1766 = vmatmul.mubr.bf16.gmra.mrb[12].mxu1 %v2159_v34 }
  0xda   :  { %1794 = vmatpush3.bf16.msra.mxu1 %v2648_v6  ;;  %1805 = vmatprep.mubr.msk.bf16.mxu1 %vm2429_vm0, %v2428_v0 }
  0xdb   :  { %1795 = vmatprep.subr.bf16.mxu1 %v2428_v0 }
  0xde   :  { %1796 = vmatpush3.bf16.msra.mxu1 %v2652_v8 }
  0xdf   :  { %1797 = vmatprep.subr.bf16.mxu1 %v2428_v0 }
  0xe2   :  { %1798 = vmatpush3.bf16.msra.mxu1 %v2655_v10 }
  0xe3   :  { %1799 = vmatprep.subr.bf16.mxu1 %v2428_v0 }
  0xe6   :  { %1800 = vmatpush3.bf16.msra.mxu1 %v2660_v13 }
  0xe7   :  { %1801 = vmatprep.subr.bf16.mxu1 %v2428_v0 }
  0xea   :  { %1802 = vmatpush3.bf16.msra.mxu1 %v2664_v15 }
  0xeb   :  { %1803 = vmatprep.subr.bf16.mxu1 %v2428_v0 }
  0xee   :  { %1804 = vmatpush3.bf16.msra.mxu1 %v2667_v17 }
  0xef   :  { %1829 = vmatprep.subr.bf16.mxu1 %v2428_v0 }
 0x183   :  { %v599_v37 = vpop.f32.mrb[0].mxu0 }
 0x184   :  { %v1739_v36 = vpop.f32.mrb[0].mxu1  ;;  %v1787_v40 = vpop.f32.mrb[1].mxu0 }
 0x185   :  { %v2713_v38 = vadd.f32 %v1739_v36, %v1490_v35  ;;  %v284_v39 = vpop.f32.mrb[1].mxu1  ;;  %v602_v43 = vpop.f32.mrb[2].mxu0 }
 0x186   :  { %v285_v41 = vadd.f32 %v1490_v35, %v284_v39  ;;  %v1740_v42 = vpop.f32.mrb[2].mxu1  ;;  %v1788_v46 = vpop.f32.mrb[3].mxu0 }
 0x187   :  { %v2715_v44 = vadd.f32 %v1740_v42, %v1490_v35  ;;  %v287_v45 = vpop.f32.mrb[3].mxu1 }
 0x188   :  { %v605_v47 = vadd.f32 %v599_v37, %v285_v41  ;;  %v288_v48 = vadd.f32 %v1490_v35, %v287_v45 }
 0x18a   :  { %2176 = vtanh.f32 %v605_v47 }
 0x18c   :  { %v1743_v49 = vpop.f32.mrb[4].mxu1 }
 0x18d   :  { %v2717_v50 = vadd.f32 %v1743_v49, %v1490_v35  ;;  %v300_v51 = vpop.f32.mrb[5].mxu1 }
 0x18e   :  { %v2719_v52 = vadd.f32 %v1490_v35, %v300_v51  ;;  %v1744_v53 = vpop.f32.mrb[6].mxu1  ;;  %v2860_v51 = vld [vmem:[#allocation14 + $0x18] sm:$0xff]  }
 0x18f   :  { %v2721_v54 = vadd.f32 %v1744_v53, %v1490_v35  ;;  %v303_v55 = vpop.f32.mrb[7].mxu1 }
 0x190   :  { %v2723_v56 = vadd.f32 %v1490_v35, %v303_v55 }
 0x194   :  { %v2177_v57 = vpop.eup %2176 }
 0x195   :  { %v607_v58 = vpack.c.bf16 %v2177_v57, %v2177_v57 }
 0x197   :  { %1806 = vmatmul.mubr.bf16.vlgmr.msra.gmra.mrb[16].mxu1 %v607_v58 }
 0x198   :  { %1830 = vmatpush3.bf16.msra.mxu1 %v2641_v2  ;;  %1845 = vmatprep.mubr.msk.bf16.mxu1 %vm2429_vm0, %v2428_v0 }
 0x199   :  { %1831 = vmatprep.subr.bf16.mxu1 %v2428_v0 }
 0x19c   :  { %1832 = vmatpush3.bf16.msra.mxu1 %v2644_v4 }
 0x19d   :  { %1833 = vmatprep.subr.bf16.mxu1 %v2428_v0 }
 0x1a0   :  { %1834 = vmatpush3.bf16.msra.mxu1 %v2648_v6 }
 0x1a1   :  { %1835 = vmatprep.subr.bf16.mxu1 %v2428_v0 }
 0x1a4   :  { %v1763_v60 = vpop.f32.mrb[8].mxu1  ;;  %1836 = vmatpush3.bf16.msra.mxu1 %v2652_v8 }
 0x1a5   :  { %v2740_v61 = vadd.f32 %v1763_v60, %v2736_v59  ;;  %v2742_v62 = vpop.f32.mrb[9].mxu1  ;;  %1837 = vmatprep.subr.bf16.mxu1 %v2428_v0 }
 0x1a6   :  { %v1764_v63 = vpop.f32.mrb[10].mxu1 }
 0x1a7   :  { %v2746_v1 = vadd.f32 %v1764_v63, %v2736_v59  ;;  %v455_v3 = vpop.f32.mrb[11].mxu1  ;;  %v2882_v63 = vld [vmem:[#allocation14 + $0x28] sm:$0xff]  }
 0x1a8   :  { %v2749_v5 = vadd.f32 %v2736_v59, %v455_v3  ;;  %1838 = vmatpush3.bf16.msra.mxu1 %v2655_v10  ;;  %v2888_v3 = vld [vmem:[#allocation14 + $0x30] sm:$0xff]  }
 0x1a9   :  { %1839 = vmatprep.subr.bf16.mxu1 %v2428_v0 }
 0x1ac   :  { %1840 = vmatpush3.bf16.msra.mxu1 %v2660_v13  ;;  %v1767_v7 = vpop.f32.mrb[12].mxu1 }
 0x1ad   :  { %1841 = vmatprep.subr.bf16.mxu1 %v2428_v0  ;;  %v2760_v9 = vadd.f32 %v1767_v7, %v2736_v59  ;;  %v468_v11 = vpop.f32.mrb[13].mxu1  ;;  %v2894_v7 = vld [vmem:[#allocation14 + $0x38] sm:$0xff]  }
 0x1ae   :  { %v2763_v12 = vadd.f32 %v2736_v59, %v468_v11  ;;  %v1768_v14 = vpop.f32.mrb[14].mxu1 }
 0x1af   :  { %v2766_v16 = vadd.f32 %v1768_v14, %v2736_v59  ;;  %v471_v18 = vpop.f32.mrb[15].mxu1 }
 0x1b0   :  { %1842 = vmatpush3.bf16.msra.mxu1 %v2664_v15  ;;  %v2769_v19 = vadd.f32 %v2736_v59, %v471_v18 }
 0x1b1   :  { %1843 = vmatprep.subr.bf16.mxu1 %v2428_v0 }
 0x1b4   :  { %1844 = vmatpush3.bf16.msra.mxu1 %v2667_v17 }
 0x1b5   :  { %1869 = vmatprep.subr.bf16.mxu1 %v2428_v0 }
 0x26a   :  { %v642_v20 = vpop.f32.mrb[16].mxu1 }
 0x26b   :  { %v648_v21 = vadd.f32 %v642_v20, %v288_v48  ;;  %v1807_v22 = vpop.f32.mrb[17].mxu1 }
 0x26c   :  { %v645_v23 = vpop.f32.mrb[18].mxu1 }
 0x26d   :  { %2178 = vtanh.f32 %v648_v21  ;;  %v1808_v24 = vpop.f32.mrb[19].mxu1 }
 0x277   :  { %v2179_v25 = vpop.eup %2178 }
 0x278   :  { %v650_v26 = vpack.c.bf16 %v2179_v25, %v2179_v25 }
 0x27a   :  { %1826 = vmatmul.mubr.bf16.vlgmr.msra.gmra.mrb[4].mxu0 %v650_v26 }
 0x27b   :  { %1850 = vmatpush3.bf16.msra.mxu0 %v2641_v2  ;;  %1865 = vmatprep.mubr.msk.bf16.mxu0 %vm2429_vm0, %v2428_v0 }
 0x27c   :  { %1851 = vmatprep.subr.bf16.mxu0 %v2428_v0 }
 0x27f   :  { %1852 = vmatpush3.bf16.msra.mxu0 %v2644_v4 }
 0x280   :  { %1853 = vmatprep.subr.bf16.mxu0 %v2428_v0 }
 0x283   :  { %1854 = vmatpush3.bf16.msra.mxu0 %v2648_v6 }
 0x284   :  { %1855 = vmatprep.subr.bf16.mxu0 %v2428_v0 }
 0x287   :  { %1856 = vmatpush3.bf16.msra.mxu0 %v2652_v8 }
 0x288   :  { %1857 = vmatprep.subr.bf16.mxu0 %v2428_v0 }
 0x28b   :  { %1858 = vmatpush3.bf16.msra.mxu0 %v2655_v10 }
 0x28c   :  { %1859 = vmatprep.subr.bf16.mxu0 %v2428_v0 }
 0x28f   :  { %1860 = vmatpush3.bf16.msra.mxu0 %v2660_v13 }
 0x290   :  { %1861 = vmatprep.subr.bf16.mxu0 %v2428_v0 }
 0x293   :  { %1862 = vmatpush3.bf16.msra.mxu0 %v2664_v15 }
 0x294   :  { %1863 = vmatprep.subr.bf16.mxu0 %v2428_v0 }
 0x297   :  { %1864 = vmatpush3.bf16.msra.mxu0 %v2667_v17 }
 0x298   :  { %1889 = vmatprep.subr.bf16.mxu0 %v2428_v0 }
 0x34d   :  { %v685_v27 = vpop.f32.mrb[4].mxu0 }
 0x34e   :  { %v691_v28 = vadd.f32 %v685_v27, %v2713_v38  ;;  %v1827_v29 = vpop.f32.mrb[5].mxu0 }
 0x34f   :  { %v688_v30 = vpop.f32.mrb[6].mxu0 }
 0x350   :  { %2180 = vtanh.f32 %v691_v28  ;;  %v1828_v31 = vpop.f32.mrb[7].mxu0 }
 0x35a   :  { %v2181_v32 = vpop.eup %2180 }
 0x35b   :  { %v693_v33 = vpack.c.bf16 %v2181_v32, %v2181_v32 }
 0x35d   :  { %1846 = vmatmul.mubr.bf16.vlgmr.msra.gmra.mrb[20].mxu1 %v693_v33 }
 0x35e   :  { %1870 = vmatpush3.bf16.msra.mxu1 %v2641_v2  ;;  %1885 = vmatprep.mubr.msk.bf16.mxu1 %vm2429_vm0, %v2428_v0 }
 0x35f   :  { %1871 = vmatprep.subr.bf16.mxu1 %v2428_v0 }
 0x362   :  { %1872 = vmatpush3.bf16.msra.mxu1 %v2644_v4 }
 0x363   :  { %1873 = vmatprep.subr.bf16.mxu1 %v2428_v0 }
 0x366   :  { %1874 = vmatpush3.bf16.msra.mxu1 %v2648_v6 }
 0x367   :  { %1875 = vmatprep.subr.bf16.mxu1 %v2428_v0 }
 0x36a   :  { %1876 = vmatpush3.bf16.msra.mxu1 %v2652_v8 }
 0x36b   :  { %1877 = vmatprep.subr.bf16.mxu1 %v2428_v0 }
 0x36e   :  { %1878 = vmatpush3.bf16.msra.mxu1 %v2655_v10 }
 0x36f   :  { %1879 = vmatprep.subr.bf16.mxu1 %v2428_v0 }
 0x372   :  { %1880 = vmatpush3.bf16.msra.mxu1 %v2660_v13 }
 0x373   :  { %1881 = vmatprep.subr.bf16.mxu1 %v2428_v0 }
 0x376   :  { %1882 = vmatpush3.bf16.msra.mxu1 %v2664_v15 }
 0x377   :  { %1883 = vmatprep.subr.bf16.mxu1 %v2428_v0 }
 0x37a   :  { %1884 = vmatpush3.bf16.msra.mxu1 %v2667_v17 }
 0x37b   :  { %1909 = vmatprep.subr.bf16.mxu1 %v2428_v0 }
 0x430   :  { %v728_v34 = vpop.f32.mrb[20].mxu1 }
 0x431   :  { %v734_v35 = vadd.f32 %v728_v34, %v2715_v44  ;;  %v1847_v36 = vpop.f32.mrb[21].mxu1 }
 0x432   :  { %v731_v37 = vpop.f32.mrb[22].mxu1 }
 0x433   :  { %2182 = vtanh.f32 %v734_v35  ;;  %v1848_v38 = vpop.f32.mrb[23].mxu1 }
 0x43d   :  { %v2183_v39 = vpop.eup %2182 }
 0x43e   :  { %v736_v40 = vpack.c.bf16 %v2183_v39, %v2183_v39 }
 0x440   :  { %1866 = vmatmul.mubr.bf16.vlgmr.msra.gmra.mrb[8].mxu0 %v736_v40 }
 0x441   :  { %1890 = vmatpush3.bf16.msra.mxu0 %v2641_v2  ;;  %1905 = vmatprep.mubr.msk.bf16.mxu0 %vm2429_vm0, %v2428_v0 }
 0x442   :  { %1891 = vmatprep.subr.bf16.mxu0 %v2428_v0 }
 0x445   :  { %1892 = vmatpush3.bf16.msra.mxu0 %v2644_v4 }
 0x446   :  { %1893 = vmatprep.subr.bf16.mxu0 %v2428_v0 }
 0x449   :  { %1894 = vmatpush3.bf16.msra.mxu0 %v2648_v6 }
 0x44a   :  { %1895 = vmatprep.subr.bf16.mxu0 %v2428_v0 }
 0x44d   :  { %1896 = vmatpush3.bf16.msra.mxu0 %v2652_v8 }
 0x44e   :  { %1897 = vmatprep.subr.bf16.mxu0 %v2428_v0 }
 0x451   :  { %1898 = vmatpush3.bf16.msra.mxu0 %v2655_v10 }
 0x452   :  { %1899 = vmatprep.subr.bf16.mxu0 %v2428_v0 }
 0x455   :  { %1900 = vmatpush3.bf16.msra.mxu0 %v2660_v13 }
 0x456   :  { %1901 = vmatprep.subr.bf16.mxu0 %v2428_v0 }
 0x459   :  { %1902 = vmatpush3.bf16.msra.mxu0 %v2664_v15 }
 0x45a   :  { %1903 = vmatprep.subr.bf16.mxu0 %v2428_v0 }
 0x45d   :  { %1904 = vmatpush3.bf16.msra.mxu0 %v2667_v17 }
 0x45e   :  { %1929 = vmatprep.subr.bf16.mxu0 %v2428_v0 }
 0x513   :  { %v771_v41 = vpop.f32.mrb[8].mxu0 }
 0x514   :  { %v777_v42 = vadd.f32 %v771_v41, %v2719_v52  ;;  %v1867_v43 = vpop.f32.mrb[9].mxu0 }
 0x515   :  { %v774_v44 = vpop.f32.mrb[10].mxu0 }
 0x516   :  { %2184 = vtanh.f32 %v777_v42  ;;  %v1868_v45 = vpop.f32.mrb[11].mxu0 }
 0x520   :  { %v2185_v46 = vpop.eup %2184 }
 0x521   :  { %v779_v47 = vpack.c.bf16 %v2185_v46, %v2185_v46 }
 0x523   :  { %1886 = vmatmul.mubr.bf16.vlgmr.msra.gmra.mrb[24].mxu1 %v779_v47 }
 0x524   :  { %1910 = vmatpush3.bf16.msra.mxu1 %v2641_v2  ;;  %1925 = vmatprep.mubr.msk.bf16.mxu1 %vm2429_vm0, %v2428_v0 }
 0x525   :  { %1911 = vmatprep.subr.bf16.mxu1 %v2428_v0 }
 0x528   :  { %1912 = vmatpush3.bf16.msra.mxu1 %v2644_v4 }
 0x529   :  { %1913 = vmatprep.subr.bf16.mxu1 %v2428_v0 }
 0x52c   :  { %1914 = vmatpush3.bf16.msra.mxu1 %v2648_v6 }
 0x52d   :  { %1915 = vmatprep.subr.bf16.mxu1 %v2428_v0 }
 0x530   :  { %1916 = vmatpush3.bf16.msra.mxu1 %v2652_v8 }
 0x531   :  { %1917 = vmatprep.subr.bf16.mxu1 %v2428_v0 }
 0x534   :  { %1918 = vmatpush3.bf16.msra.mxu1 %v2655_v10 }
 0x535   :  { %1919 = vmatprep.subr.bf16.mxu1 %v2428_v0 }
 0x538   :  { %1920 = vmatpush3.bf16.msra.mxu1 %v2660_v13  ;;  %v2849_v13 = vld [vmem:[#allocation14] sm:$0xff]  }
 0x539   :  { %1921 = vmatprep.subr.bf16.mxu1 %v2428_v0 }
 0x53c   :  { %1922 = vmatpush3.bf16.msra.mxu1 %v2664_v15  ;;  %v2852_v15 = vld [vmem:[#allocation14 + $0x8] sm:$0xff]  }
 0x53d   :  { %1923 = vmatprep.subr.bf16.mxu1 %v2428_v0 }
 0x540   :  { %1924 = vmatpush3.bf16.msra.mxu1 %v2667_v17  ;;  %v2856_v17 = vld [vmem:[#allocation14 + $0x10] sm:$0xff]  }
 0x541   :  { %1949 = vmatprep.subr.bf16.mxu1 %v2428_v0 }
 0x5f6   :  { %v814_v2 = vpop.f32.mrb[24].mxu1 }
 0x5f7   :  { %v820_v4 = vadd.f32 %v814_v2, %v2723_v56  ;;  %v1887_v6 = vpop.f32.mrb[25].mxu1 }
 0x5f8   :  { %v817_v8 = vpop.f32.mrb[26].mxu1 }
 0x5f9   :  { %2186 = vtanh.f32 %v820_v4  ;;  %v1888_v10 = vpop.f32.mrb[27].mxu1 }
 0x603   :  { %v2187_v48 = vpop.eup %2186 }
 0x604   :  { %v822_v49 = vpack.c.bf16 %v2187_v48, %v2187_v48 }
 0x606   :  { %1906 = vmatmul.mubr.bf16.vlgmr.msra.gmra.mrb[12].mxu0 %v822_v49 }
 0x607   :  { %1945 = vmatprep.mubr.msk.bf16.mxu0 %vm2429_vm0, %v2428_v0  ;;  %1930 = vmatpush3.bf16.msra.mxu0 %v2849_v13 }
 0x608   :  { %1931 = vmatprep.subr.bf16.mxu0 %v2428_v0 }
 0x60b   :  { %1932 = vmatpush3.bf16.msra.mxu0 %v2852_v15 }
 0x60c   :  { %1933 = vmatprep.subr.bf16.mxu0 %v2428_v0 }
 0x60f   :  { %1934 = vmatpush3.bf16.msra.mxu0 %v2856_v17 }
 0x610   :  { %1935 = vmatprep.subr.bf16.mxu0 %v2428_v0 }
 0x613   :  { %1936 = vmatpush3.bf16.msra.mxu0 %v2860_v51 }
 0x614   :  { %1937 = vmatprep.subr.bf16.mxu0 %v2428_v0 }
 0x6d9   :  { %v857_v52 = vpop.f32.mrb[12].mxu0 }
 0x6da   :  { %v863_v53 = vadd.f32 %v857_v52, %v2717_v50  ;;  %v1907_v55 = vpop.f32.mrb[13].mxu0  ;;  %v2876_v50 = vld [vmem:[#allocation14 + $0x20] sm:$0xff]  }
 0x6db   :  { %v860_v56 = vpop.f32.mrb[14].mxu0  ;;  %1938 = vmatpush3.bf16.msra.mxu0 %v2876_v50 }
 0x6dc   :  { %2188 = vtanh.f32 %v863_v53  ;;  %v1908_v57 = vpop.f32.mrb[15].mxu0  ;;  %1939 = vmatprep.subr.bf16.mxu0 %v2428_v0 }
 0x6dd   :  { %v2169_v57 = vld [vmem:[#allocation15 + $0x8] sm:$0xff]  }
 0x6df   :  { %1940 = vmatpush3.bf16.msra.mxu0 %v2882_v63 }
 0x6e0   :  { %1941 = vmatprep.subr.bf16.mxu0 %v2428_v0 }
 0x6e3   :  { %1942 = vmatpush3.bf16.msra.mxu0 %v2888_v3 }
 0x6e4   :  { %1943 = vmatprep.subr.bf16.mxu0 %v2428_v0 }
 0x6e6   :  { %v2189_v58 = vpop.eup %2188 }
 0x6e7   :  { %v865_v60 = vpack.c.bf16 %v2189_v58, %v2189_v58  ;;  %1944 = vmatpush3.bf16.msra.mxu0 %v2894_v7 }
 0x6e8   :  { %1969 = vmatprep.subr.bf16.mxu0 %v2428_v0 }
 0x6e9   :  { %1926 = vmatmul.mubr.bf16.vlgmr.msra.gmra.mrb[28].mxu1 %v865_v60 }
 0x6ea   :  { %1950 = vmatpush3.bf16.msra.mxu1 %v2849_v13  ;;  %1965 = vmatprep.mubr.msk.bf16.mxu1 %vm2429_vm0, %v2428_v0 }
 0x6eb   :  { %1951 = vmatprep.subr.bf16.mxu1 %v2428_v0 }
 0x6ee   :  { %1952 = vmatpush3.bf16.msra.mxu1 %v2852_v15 }
 0x6ef   :  { %1953 = vmatprep.subr.bf16.mxu1 %v2428_v0 }
 0x6f2   :  { %1954 = vmatpush3.bf16.msra.mxu1 %v2856_v17 }
 0x6f3   :  { %1955 = vmatprep.subr.bf16.mxu1 %v2428_v0 }
 0x6f6   :  { %1956 = vmatpush3.bf16.msra.mxu1 %v2860_v51 }
 0x6f7   :  { %1957 = vmatprep.subr.bf16.mxu1 %v2428_v0 }
 0x6fa   :  { %1958 = vmatpush3.bf16.msra.mxu1 %v2876_v50 }
 0x6fb   :  { %1959 = vmatprep.subr.bf16.mxu1 %v2428_v0 }
 0x6fe   :  { %1960 = vmatpush3.bf16.msra.mxu1 %v2882_v63 }
 0x6ff   :  { %1961 = vmatprep.subr.bf16.mxu1 %v2428_v0 }
 0x702   :  { %1962 = vmatpush3.bf16.msra.mxu1 %v2888_v3 }
 0x703   :  { %1963 = vmatprep.subr.bf16.mxu1 %v2428_v0 }
 0x706   :  { %1964 = vmatpush3.bf16.msra.mxu1 %v2894_v7 }
 0x707   :  { %1989 = vmatprep.subr.bf16.mxu1 %v2428_v0 }
 0x7bc   :  { %v900_v11 = vpop.f32.mrb[28].mxu1 }
 0x7bd   :  { %v906_v14 = vadd.f32 %v900_v11, %v2721_v54  ;;  %v1927_v18 = vpop.f32.mrb[29].mxu1  ;;  %v453_v54 = vadd.f32 %v2736_v59, %v2742_v62 }
 0x7be   :  { %v903_v20 = vpop.f32.mrb[30].mxu1 }
 0x7bf   :  { %2190 = vtanh.f32 %v906_v14  ;;  %v1928_v21 = vpop.f32.mrb[31].mxu1 }
 0x7c9   :  { %v2191_v22 = vpop.eup %2190 }
 0x7ca   :  { %v908_v23 = vpack.c.bf16 %v2191_v22, %v2191_v22 }
 0x7cc   :  { %1946 = vmatmul.mubr.bf16.vlgmr.msra.gmra.mrb[16].mxu0 %v908_v23 }
 0x7cd   :  { %1970 = vmatpush3.bf16.msra.mxu0 %v2849_v13  ;;  %1985 = vmatprep.mubr.msk.bf16.mxu0 %vm2429_vm0, %v2428_v0 }
 0x7ce   :  { %1971 = vmatprep.subr.bf16.mxu0 %v2428_v0 }
 0x7d1   :  { %1972 = vmatpush3.bf16.msra.mxu0 %v2852_v15 }
 0x7d2   :  { %1973 = vmatprep.subr.bf16.mxu0 %v2428_v0 }
 0x7d5   :  { %1974 = vmatpush3.bf16.msra.mxu0 %v2856_v17 }
 0x7d6   :  { %1975 = vmatprep.subr.bf16.mxu0 %v2428_v0 }
 0x7d9   :  { %1976 = vmatpush3.bf16.msra.mxu0 %v2860_v51 }
 0x7da   :  { %1977 = vmatprep.subr.bf16.mxu0 %v2428_v0 }
 0x7dd   :  { %1978 = vmatpush3.bf16.msra.mxu0 %v2876_v50 }
 0x7de   :  { %1979 = vmatprep.subr.bf16.mxu0 %v2428_v0 }
 0x7e1   :  { %1980 = vmatpush3.bf16.msra.mxu0 %v2882_v63 }
 0x7e2   :  { %1981 = vmatprep.subr.bf16.mxu0 %v2428_v0 }
 0x7e5   :  { %1982 = vmatpush3.bf16.msra.mxu0 %v2888_v3 }
 0x7e6   :  { %1983 = vmatprep.subr.bf16.mxu0 %v2428_v0 }
 0x7e9   :  { %1984 = vmatpush3.bf16.msra.mxu0 %v2894_v7 }
 0x7ea   :  { %2009 = vmatprep.subr.bf16.mxu0 %v2428_v0 }
 0x89f   :  { %v991_v24 = vpop.f32.mrb[16].mxu0 }
 0x8a0   :  { %v997_v25 = vadd.f32 %v991_v24, %v453_v54  ;;  %v1947_v26 = vpop.f32.mrb[17].mxu0 }
 0x8a1   :  { %v994_v27 = vpop.f32.mrb[18].mxu0 }
 0x8a2   :  { %2192 = vtanh.f32 %v997_v25  ;;  %v1948_v28 = vpop.f32.mrb[19].mxu0  ;;  %v1532_v25 = vld [vmem:[%s3041_s10] ss:$0 sm:$0xff]  ;;  %s2430_s10 = smov [#allocation17]  }
 0x8a3   :  { %s1474_s16 = sshll.u32 %s2430_s10, 4  ;;  %s1475_s16 = int_to_ptr.vmem [resolvable:$true] %s1474_s16 }
 0x8a4   :  { %s2384_s17 = scalar_lea.vmem %s1475_s16, 1024  ;;  %p2389_p9 = scmp.lt.s32.totalorder %s1475_s16, %s1475_s16 }
 0x8a5   :  { %p2385_p8 = scmp.ne.s32.totalorder %s1475_s16, %s2384_s17  ;;  %p2390_p10 = scmp.lt.s32.totalorder %s2384_s17, %s2384_s17 }
 0x8a7   :  { %p2391_p11 = por %p2390_p10, %p2389_p9 }
 0x8a9   :  { %p2392_p12 = pnand %p2391_p11, %p2385_p8 }
 0x8ac   :  { %v2193_v29 = vpop.eup %2192 }
 0x8ad   :  { %v999_v30 = vpack.c.bf16 %v2193_v29, %v2193_v29 }
 0x8af   :  { %1000 = vst [vmem:[#allocation2] sm:$0xf] %v999_v30  ;;  %1966 = vmatmul.mubr.bf16.vlgmr.msra.gmra.mrb[32].mxu1 %v999_v30 }
 0x8b0   :  { %1990 = vmatpush3.bf16.msra.mxu1 %v2849_v13  ;;  %2005 = vmatprep.mubr.msk.bf16.mxu1 %vm2429_vm0, %v2428_v0 }
 0x8b1   :  { %1991 = vmatprep.subr.bf16.mxu1 %v2428_v0 }
 0x8b4   :  { %1992 = vmatpush3.bf16.msra.mxu1 %v2852_v15 }
 0x8b5   :  { %1993 = vmatprep.subr.bf16.mxu1 %v2428_v0 }
 0x8b8   :  { %1994 = vmatpush3.bf16.msra.mxu1 %v2856_v17 }
 0x8b9   :  { %1995 = vmatprep.subr.bf16.mxu1 %v2428_v0 }
 0x8bc   :  { %1996 = vmatpush3.bf16.msra.mxu1 %v2860_v51 }
 0x8bd   :  { %1997 = vmatprep.subr.bf16.mxu1 %v2428_v0 }
 0x8c0   :  { %1998 = vmatpush3.bf16.msra.mxu1 %v2876_v50 }
 0x8c1   :  { %1999 = vmatprep.subr.bf16.mxu1 %v2428_v0 }
 0x8c4   :  { %2000 = vmatpush3.bf16.msra.mxu1 %v2882_v63 }
 0x8c5   :  { %2001 = vmatprep.subr.bf16.mxu1 %v2428_v0 }
 0x8c8   :  { %2002 = vmatpush3.bf16.msra.mxu1 %v2888_v3 }
 0x8c9   :  { %2003 = vmatprep.subr.bf16.mxu1 %v2428_v0 }
 0x8cc   :  { %2004 = vmatpush3.bf16.msra.mxu1 %v2894_v7 }
 0x8cd   :  { %2029 = vmatprep.subr.bf16.mxu1 %v2428_v0 }
 0x982   :  { %v1035_v59 = vpop.f32.mrb[32].mxu1 }
 0x983   :  { %v1041_v62 = vadd.f32 %v1035_v59, %v2749_v5  ;;  %v1967_v31 = vpop.f32.mrb[33].mxu1 }
 0x984   :  { %v1038_v32 = vpop.f32.mrb[34].mxu1 }
 0x985   :  { %2194 = vtanh.f32 %v1041_v62  ;;  %v1968_v33 = vpop.f32.mrb[35].mxu1 }
 0x98f   :  { %v2195_v34 = vpop.eup %2194 }
 0x990   :  { %v1043_v35 = vpack.c.bf16 %v2195_v34, %v2195_v34 }
 0x992   :  { %v1045_v36 = vrot.slane %v1043_v35, 4  ;;  %1986 = vmatmul.mubr.bf16.vlgmr.msra.gmra.mrb[20].mxu0 %v1043_v35 }
 0x993   :  { %2010 = vmatpush3.bf16.msra.mxu0 %v2849_v13  ;;  %2025 = vmatprep.mubr.msk.bf16.mxu0 %vm2429_vm0, %v2428_v0 }
 0x994   :  { %1047 = vst [vmem:[#allocation2] sm:$0xf0] %v1045_v36  ;;  %2011 = vmatprep.subr.bf16.mxu0 %v2428_v0 }
 0x997   :  { %2012 = vmatpush3.bf16.msra.mxu0 %v2852_v15 }
 0x998   :  { %2013 = vmatprep.subr.bf16.mxu0 %v2428_v0 }
 0x99b   :  { %2014 = vmatpush3.bf16.msra.mxu0 %v2856_v17  ;;  %v1321_v60 = vld [vmem:[#allocation2] sm:$0xff] }
 0x99c   :  { %2015 = vmatprep.subr.bf16.mxu0 %v2428_v0 }
 0x99f   :  { %2016 = vmatpush3.bf16.msra.mxu0 %v2860_v51 }
 0x9a0   :  { %2017 = vmatprep.subr.bf16.mxu0 %v2428_v0 }
 0x9a3   :  { %2018 = vmatpush3.bf16.msra.mxu0 %v2876_v50 }
 0x9a4   :  { %2019 = vmatprep.subr.bf16.mxu0 %v2428_v0 }
 0x9a7   :  { %2020 = vmatpush3.bf16.msra.mxu0 %v2882_v63 }
 0x9a8   :  { %2021 = vmatprep.subr.bf16.mxu0 %v2428_v0 }
 0x9ab   :  { %2022 = vmatpush3.bf16.msra.mxu0 %v2888_v3 }
 0x9ac   :  { %2023 = vmatprep.subr.bf16.mxu0 %v2428_v0 }
 0x9af   :  { %2024 = vmatpush3.bf16.msra.mxu0 %v2894_v7 }
 0x9b0   :  { %2049 = vmatprep.subr.bf16.mxu0 %v2428_v0 }
 0xa65   :  { %v1082_v5 = vpop.f32.mrb[20].mxu0 }
 0xa66   :  { %v1088_v37 = vadd.f32 %v1082_v5, %v2740_v61  ;;  %v1987_v38 = vpop.f32.mrb[21].mxu0 }
 0xa67   :  { %v1085_v39 = vpop.f32.mrb[22].mxu0 }
 0xa68   :  { %2196 = vtanh.f32 %v1088_v37  ;;  %v1988_v40 = vpop.f32.mrb[23].mxu0 }
 0xa72   :  { %v2197_v41 = vpop.eup %2196 }
 0xa73   :  { %v1090_v42 = vpack.c.bf16 %v2197_v41, %v2197_v41 }
 0xa75   :  { %1091 = vst [vmem:[#allocation2 + $0x8] sm:$0xf] %v1090_v42  ;;  %2006 = vmatmul.mubr.bf16.vlgmr.msra.gmra.mrb[36].mxu1 %v1090_v42 }
 0xa76   :  { %2030 = vmatpush3.bf16.msra.mxu1 %v2849_v13  ;;  %2045 = vmatprep.mubr.msk.bf16.mxu1 %vm2429_vm0, %v2428_v0 }
 0xa77   :  { %2031 = vmatprep.subr.bf16.mxu1 %v2428_v0 }
 0xa7a   :  { %2032 = vmatpush3.bf16.msra.mxu1 %v2852_v15 }
 0xa7b   :  { %2033 = vmatprep.subr.bf16.mxu1 %v2428_v0 }
 0xa7e   :  { %2034 = vmatpush3.bf16.msra.mxu1 %v2856_v17 }
 0xa7f   :  { %2035 = vmatprep.subr.bf16.mxu1 %v2428_v0 }
 0xa82   :  { %2036 = vmatpush3.bf16.msra.mxu1 %v2860_v51 }
 0xa83   :  { %2037 = vmatprep.subr.bf16.mxu1 %v2428_v0 }
 0xa86   :  { %2038 = vmatpush3.bf16.msra.mxu1 %v2876_v50 }
 0xa87   :  { %2039 = vmatprep.subr.bf16.mxu1 %v2428_v0 }
 0xa8a   :  { %2040 = vmatpush3.bf16.msra.mxu1 %v2882_v63 }
 0xa8b   :  { %2041 = vmatprep.subr.bf16.mxu1 %v2428_v0 }
 0xa8e   :  { %2042 = vmatpush3.bf16.msra.mxu1 %v2888_v3 }
 0xa8f   :  { %2043 = vmatprep.subr.bf16.mxu1 %v2428_v0 }
 0xa92   :  { %2044 = vmatpush3.bf16.msra.mxu1 %v2894_v7 }
 0xa93   :  { %2069 = vmatprep.subr.bf16.mxu1 %v2428_v0 }
 0xb48   :  { %v1126_v61 = vpop.f32.mrb[36].mxu1 }
 0xb49   :  { %v1132_v43 = vadd.f32 %v1126_v61, %v2746_v1  ;;  %v2007_v44 = vpop.f32.mrb[37].mxu1 }
 0xb4a   :  { %v1129_v45 = vpop.f32.mrb[38].mxu1 }
 0xb4b   :  { %2198 = vtanh.f32 %v1132_v43  ;;  %v2008_v46 = vpop.f32.mrb[39].mxu1 }
 0xb55   :  { %v2199_v47 = vpop.eup %2198 }
 0xb56   :  { %v1134_v2 = vpack.c.bf16 %v2199_v47, %v2199_v47 }
 0xb58   :  { %v1136_v4 = vrot.slane %v1134_v2, 4  ;;  %2026 = vmatmul.mubr.bf16.vlgmr.msra.gmra.mrb[24].mxu0 %v1134_v2 }
 0xb59   :  { %2050 = vmatpush3.bf16.msra.mxu0 %v2849_v13  ;;  %2065 = vmatprep.mubr.msk.bf16.mxu0 %vm2429_vm0, %v2428_v0 }
 0xb5a   :  { %1138 = vst [vmem:[#allocation2 + $0x8] sm:$0xf0] %v1136_v4  ;;  %2051 = vmatprep.subr.bf16.mxu0 %v2428_v0 }
 0xb5d   :  { %2052 = vmatpush3.bf16.msra.mxu0 %v2852_v15 }
 0xb5e   :  { %2053 = vmatprep.subr.bf16.mxu0 %v2428_v0 }
 0xb61   :  { %2054 = vmatpush3.bf16.msra.mxu0 %v2856_v17  ;;  %v1322_v11 = vld [vmem:[#allocation2 + $0x8] sm:$0xff] }
 0xb62   :  { %2055 = vmatprep.subr.bf16.mxu0 %v2428_v0 }
 0xb65   :  { %2056 = vmatpush3.bf16.msra.mxu0 %v2860_v51 }
 0xb66   :  { %2057 = vmatprep.subr.bf16.mxu0 %v2428_v0 }
 0xb69   :  { %2058 = vmatpush3.bf16.msra.mxu0 %v2876_v50 }
 0xb6a   :  { %2059 = vmatprep.subr.bf16.mxu0 %v2428_v0 }
 0xb6d   :  { %2060 = vmatpush3.bf16.msra.mxu0 %v2882_v63 }
 0xb6e   :  { %2061 = vmatprep.subr.bf16.mxu0 %v2428_v0 }
 0xb71   :  { %2062 = vmatpush3.bf16.msra.mxu0 %v2888_v3 }
 0xb72   :  { %2063 = vmatprep.subr.bf16.mxu0 %v2428_v0 }
 0xb75   :  { %2064 = vmatpush3.bf16.msra.mxu0 %v2894_v7 }
 0xc2b   :  { %v1173_v1 = vpop.f32.mrb[24].mxu0 }
 0xc2c   :  { %v1179_v6 = vadd.f32 %v1173_v1, %v2763_v12  ;;  %v2027_v8 = vpop.f32.mrb[25].mxu0  ;;  %v2168_v12 = vld [vmem:[#allocation15] sm:$0xff]  }
 0xc2d   :  { %v1176_v10 = vpop.f32.mrb[26].mxu0  ;;  %2089 = vmatprep.subr.bf16.mxu0 %v2168_v12 }
 0xc2e   :  { %2200 = vtanh.f32 %v1179_v6  ;;  %v2028_v48 = vpop.f32.mrb[27].mxu0 }
 0xc38   :  { %v2201_v49 = vpop.eup %2200 }
 0xc39   :  { %v1181_v52 = vpack.c.bf16 %v2201_v49, %v2201_v49 }
 0xc3b   :  { %1182 = vst [vmem:[#allocation2 + $0x10] sm:$0xf] %v1181_v52  ;;  %2046 = vmatmul.mubr.bf16.vlgmr.msra.gmra.mrb[40].mxu1 %v1181_v52 }
 0xc3c   :  { %2070 = vmatpush3.bf16.msra.mxu1 %v2849_v13  ;;  %2085 = vmatprep.mubr.msk.bf16.mxu1 %vm2429_vm0, %v2428_v0 }
 0xc3d   :  { %2071 = vmatprep.subr.bf16.mxu1 %v2428_v0 }
 0xc40   :  { %2072 = vmatpush3.bf16.msra.mxu1 %v2852_v15 }
 0xc41   :  { %2073 = vmatprep.subr.bf16.mxu1 %v2428_v0 }
 0xc44   :  { %2074 = vmatpush3.bf16.msra.mxu1 %v2856_v17 }
 0xc45   :  { %2075 = vmatprep.subr.bf16.mxu1 %v2428_v0 }
 0xc48   :  { %2076 = vmatpush3.bf16.msra.mxu1 %v2860_v51 }
 0xc49   :  { %2077 = vmatprep.subr.bf16.mxu1 %v2428_v0 }
 0xc4c   :  { %2078 = vmatpush3.bf16.msra.mxu1 %v2876_v50  ;;  %v2171_v50 = vld [vmem:[#allocation15 + $0x18] sm:$0xff]  }
 0xc4d   :  { %2079 = vmatprep.subr.bf16.mxu1 %v2428_v0 }
 0xc50   :  { %2080 = vmatpush3.bf16.msra.mxu1 %v2882_v63  ;;  %v2173_v63 = vld [vmem:[#allocation15 + $0x28] sm:$0xff]  }
 0xc51   :  { %2081 = vmatprep.subr.bf16.mxu1 %v2428_v0 }
 0xc54   :  { %2082 = vmatpush3.bf16.msra.mxu1 %v2888_v3  ;;  %v2174_v3 = vld [vmem:[#allocation15 + $0x30] sm:$0xff]  }
 0xc55   :  { %2083 = vmatprep.subr.bf16.mxu1 %v2428_v0  ;;  %v2170_v0 = vld [vmem:[#allocation15 + $0x10] sm:$0xff]  }
 0xc58   :  { %2084 = vmatpush3.bf16.msra.mxu1 %v2894_v7  ;;  %v2175_v7 = vld [vmem:[#allocation15 + $0x38] sm:$0xff]  }
 0xd0e   :  { %v1217_v13 = vpop.f32.mrb[40].mxu1 }
 0xd0f   :  { %v1223_v15 = vadd.f32 %v1217_v13, %v2769_v19  ;;  %v2047_v17 = vpop.f32.mrb[41].mxu1  ;;  %v2172_v19 = vld [vmem:[#allocation15 + $0x20] sm:$0xff]  }
 0xd10   :  { %v1220_v51 = vpop.f32.mrb[42].mxu1 }
 0xd11   :  { %2202 = vtanh.f32 %v1223_v15  ;;  %v2048_v53 = vpop.f32.mrb[43].mxu1 }
 0xd1b   :  { %v2203_v55 = vpop.eup %2202 }
 0xd1c   :  { %v1225_v56 = vpack.c.bf16 %v2203_v55, %v2203_v55 }
 0xd1e   :  { %v1227_v58 = vrot.slane %v1225_v56, 4  ;;  %2066 = vmatmul.mubr.bf16.vlgmr.msra.gmra.mrb[28].mxu0 %v1225_v56 }
 0xd1f   :  { %2090 = vmatpush3.bf16.msra.mxu0 %v2168_v12  ;;  %2105 = vmatprep.mubr.bf16.mxu0 %v1321_v60 }
 0xd20   :  { %1229 = vst [vmem:[#allocation2 + $0x10] sm:$0xf0] %v1227_v58  ;;  %2091 = vmatprep.subr.bf16.mxu0 %v2169_v57 }
 0xd23   :  { %2092 = vmatpush3.bf16.msra.mxu0 %v2169_v57 }
 0xd24   :  { %2093 = vmatprep.subr.bf16.mxu0 %v2170_v0 }
 0xd27   :  { %2094 = vmatpush3.bf16.msra.mxu0 %v2170_v0  ;;  %v1323_v14 = vld [vmem:[#allocation2 + $0x10] sm:$0xff] }
 0xd28   :  { %2095 = vmatprep.subr.bf16.mxu0 %v2171_v50 }
 0xd2b   :  { %2096 = vmatpush3.bf16.msra.mxu0 %v2171_v50 }
 0xd2c   :  { %2097 = vmatprep.subr.bf16.mxu0 %v2172_v19 }
 0xd2f   :  { %2098 = vmatpush3.bf16.msra.mxu0 %v2172_v19 }
 0xd30   :  { %2099 = vmatprep.subr.bf16.mxu0 %v2173_v63 }
 0xd33   :  { %2100 = vmatpush3.bf16.msra.mxu0 %v2173_v63 }
 0xd34   :  { %2101 = vmatprep.subr.bf16.mxu0 %v2174_v3 }
 0xd37   :  { %2102 = vmatpush3.bf16.msra.mxu0 %v2174_v3 }
 0xd38   :  { %2103 = vmatprep.subr.bf16.mxu0 %v2175_v7 }
 0xd3b   :  { %2104 = vmatpush3.bf16.msra.mxu0 %v2175_v7 }
 0xd3e   :  { %2106 = vmatmul.mubr.bf16.vlgmr.msra.gmra.mrb[32].mxu0 %v1322_v11 }
 0xd3f   :  { %2109 = vmatprep.mubr.bf16.mxu0 %v1323_v14 }
 0xdf1   :  { %v1264_v18 = vpop.f32.mrb[28].mxu0 }
 0xdf2   :  { %v1270_v20 = vadd.f32 %v1264_v18, %v2760_v9  ;;  %v2067_v21 = vpop.f32.mrb[29].mxu0 }
 0xdf3   :  { %v1267_v22 = vpop.f32.mrb[30].mxu0 }
 0xdf4   :  { %2204 = vtanh.f32 %v1270_v20  ;;  %v2068_v23 = vpop.f32.mrb[31].mxu0 }
 0xdfe   :  { %v2205_v54 = vpop.eup %2204 }
 0xdff   :  { %v1272_v24 = vpack.c.bf16 %v2205_v54, %v2205_v54 }
 0xe01   :  { %1273 = vst [vmem:[#allocation2 + $0x18] sm:$0xf] %v1272_v24  ;;  %2086 = vmatmul.mubr.bf16.vlgmr.msra.gmra.mrb[44].mxu1 %v1272_v24 }
 0xe11   :  { %v2107_v26 = vpop.f32.mrb[32].mxu0 }
 0xe12   :  { %v1439_v27 = vadd.f32 %v2107_v26, %v1532_v25  ;;  %v1430_v28 = vpop.f32.mrb[33].mxu0 }
 0xe13   :  { %v1431_v29 = vadd.f32 %v1532_v25, %v1430_v28  ;;  %v2108_v30 = vpop.f32.mrb[34].mxu0 }
 0xe14   :  { %1463 = vst [vmem:[#allocation17 + $0x10] sm:$0xff] %v1439_v27  ;;  %v1442_v59 = vadd.f32 %v2108_v30, %v1532_v25  ;;  %v1433_v9 = vpop.f32.mrb[35].mxu0 }
 0xe15   :  { %1461 = vst [vmem:[#allocation17] sm:$0xff] %v1431_v29  ;;  %v1434_v62 = vadd.f32 %v1532_v25, %v1433_v9 }
 0xe16   :  { %1464 = vst [vmem:[#allocation17 + $0x18] sm:$0xff] %v1442_v59 }
 0xe17   :  { %1462 = vst [vmem:[#allocation17 + $0x8] sm:$0xff] %v1434_v62 }
 0xed4   :  { %v1308_v31 = vpop.f32.mrb[44].mxu1 }
 0xed5   :  { %v1314_v32 = vadd.f32 %v1308_v31, %v2766_v16  ;;  %v2087_v33 = vpop.f32.mrb[45].mxu1 }
 0xed6   :  { %v1311_v34 = vpop.f32.mrb[46].mxu1 }
 0xed7   :  { %2206 = vtanh.f32 %v1314_v32  ;;  %v2088_v35 = vpop.f32.mrb[47].mxu1 }
 0xee1   :  { %v2207_v36 = vpop.eup %2206 }
 0xee2   :  { %v1316_v5 = vpack.c.bf16 %v2207_v36, %v2207_v36 }
 0xee4   :  { %v1318_v37 = vrot.slane %v1316_v5, 4 }
 0xee6   :  { %1320 = vst [vmem:[#allocation2 + $0x18] sm:$0xf0] %v1318_v37 }
 0xeed   :  { %v1324_v38 = vld [vmem:[#allocation2 + $0x18] sm:$0xff] }
 0xeee   :  { %2110 = vmatmul.mubr.bf16.gmra.mrb[36].mxu0 %v1324_v38 }
 0xfc1   :  { %v2111_v39 = vpop.f32.mrb[36].mxu0 }
 0xfc2   :  { %v1455_v40 = vadd.f32 %v2111_v39, %v1532_v25  ;;  %v1446_v41 = vpop.f32.mrb[37].mxu0 }
 0xfc3   :  { %v1447_v42 = vadd.f32 %v1532_v25, %v1446_v41  ;;  %v2112_v61 = vpop.f32.mrb[38].mxu0 }
 0xfc4   :  { %1467 = vst [vmem:[#allocation17 + $0x30] sm:$0xff] %v1455_v40  ;;  %v1458_v43 = vadd.f32 %v2112_v61, %v1532_v25  ;;  %v1449_v16 = vpop.f32.mrb[39].mxu0 }
 0xfc5   :  { %1465 = vst [vmem:[#allocation17 + $0x20] sm:$0xff] %v1447_v42  ;;  %v1450_v44 = vadd.f32 %v1532_v25, %v1449_v16 }
 0xfc6   :  { %1468 = vst [vmem:[#allocation17 + $0x38] sm:$0xff] %v1458_v43 }
 0xfc7   :  { %1466 = vst [vmem:[#allocation17 + $0x28] sm:$0xff] %v1450_v44 }
 0xfc8   :  { %2395 = shalt.err (!%p2392_p12)
}
 0xfc9   :  { %s2396_s19 = scalar_lea.hbm %s3042_s11, 1024 }
 0xfca   :  { %p2397_p13 = scmp.ne.s32.totalorder %s3042_s11, %s2396_s19  ;;  %p2400_p0 = scmp.lt.u32.totalorder %s2396_s19, %s3042_s11 }
 0xfcc   :  { %p2402_p1 = pnand %p2400_p0, %p2397_p13 }
 0xfce   :  { %2405 = shalt.err (!%p2402_p1)
}
 0xfcf   :  { %s2431_s23 = smov 128   ;;  %s2432_s4 = smov 8  }
 0xfd0   :  { %1480 = dma.vmem_to_hbm [thread:$0]  %s1475_s16, 1024, %s3042_s11, [#allocation5], %s2431_s23, %s2431_s23, %s2432_s4  }
 0xfd1   :  { %2416 = dma.done.wait [#allocation5], 1024  }
 0xfd2   :  { %2417 = vsyncadd [#allocation5], 4294966272 }
 0xfd3   :  { %1484 = vsyncpa [#allocation4], 1 }
 0xfd4   :  { %1485 = vsyncpa [#allocation7], 1 }
 0xfd5   :  { %1486 = vsyncpa [#allocation10], 1 }
 0xfd6   :  { %1487 = vsyncpa [#allocation13], 1 }
 0xfd7   :  { %1488 = vsyncpa [#allocation16], 1 }
 0xfd8   :  { %1489 = vsyncpa [#allocation5], 1 }

</bundles_post_ra>
